<compile_context>
chip_gen: v7x
topology: tpu7x:2x2x1
jax: 0.10.0
libtpu: 0.0.40
codegen_flags: <defaults>
</compile_context>

<pallas_src>
import jax
import jax.numpy as jnp
from jax.experimental import pallas as pl
from jax.experimental.pallas import tpu as pltpu

# ----------------------------------------------------------------------------
# Config (small, consistent with the module's forward)
# ----------------------------------------------------------------------------
VOCAB_SIZE = 100
MAX_POS = 64
TYPE_VOCAB = 2
HIDDEN = 32
NUM_HEADS = 4
HEAD_DIM = HIDDEN // NUM_HEADS
INTERMEDIATE = 64
NUM_LAYERS = 2
LN_EPS = 1e-12


# ----------------------------------------------------------------------------
# In-kernel helpers (pure jnp on values, traced inside the Pallas kernel)
# ----------------------------------------------------------------------------
def _ln(x, g, b):
    mean = jnp.mean(x, axis=-1, keepdims=True)
    cent = x - mean
    var = jnp.mean(cent * cent, axis=-1, keepdims=True)
    return cent * jax.lax.rsqrt(var + LN_EPS) * g + b


def _gelu(x):
    # TF-BERT tanh-approximation gelu.
    return 0.5 * x * (1.0 + jnp.tanh(0.7978845608028654 * (x + 0.044715 * x * x * x)))


# ----------------------------------------------------------------------------
# Fused encoder kernel: one grid step == one batch element through ALL layers
# ----------------------------------------------------------------------------
def _encoder_kernel(x_ref, pad_ref, eg_ref, eb_ref,
                    wqkv_ref, bqkv_ref, wo_ref, bo_ref,
                    ln1g_ref, ln1b_ref, wi_ref, bi_ref,
                    wout_ref, bout_ref, ln2g_ref, ln2b_ref,
                    o_ref):
    H, Dh = HIDDEN, HEAD_DIM

    pad = pad_ref[...]                                          # (1, S) additive key bias
    # Embedding LayerNorm seeds the hidden state (f32).
    h = _ln(x_ref[...], eg_ref[...], eb_ref[...])               # (S, H)

    for layer in range(NUM_LAYERS):                             # static unroll over layers
        wqkv = wqkv_ref[layer]                                  # (H, 3H) bf16, VMEM-resident
        wo = wo_ref[layer]                                      # (H, H)  bf16
        wi = wi_ref[layer]                                      # (H, I)  bf16
        wout = wout_ref[layer]                                  # (I, H)  bf16

        # --- fused QKV projection: one (S, H) @ (H, 3H) matmul (bf16 x bf16 -> f32)
        qkv = jnp.dot(h.astype(jnp.bfloat16), wqkv,
                      preferred_element_type=jnp.float32) + bqkv_ref[layer]   # (S, 3H)

        # --- multi-head self-attention; head concat folded into Wo accumulation
        attn = None
        for hh in range(NUM_HEADS):                             # static unroll (4)
            qh = qkv[:, hh * Dh:(hh + 1) * Dh]                  # (S, Dh)
            kh = qkv[:, H + hh * Dh:H + (hh + 1) * Dh]          # (S, Dh)
            vh = qkv[:, 2 * H + hh * Dh:2 * H + (hh + 1) * Dh]  # (S, Dh)
            # 1/sqrt(Dh) already folded into Wq/bq at init time.
            s = jax.lax.dot_general(qh, kh, (((1,), (1,)), ((), ())),
                                    preferred_element_type=jnp.float32)       # (S, S)
            s = s + pad
            s = s - jnp.max(s, axis=-1, keepdims=True)
            p = jnp.exp(s)
            p = p * pl.reciprocal(jnp.sum(p, axis=-1, keepdims=True), approx=True)
            ctx = jnp.dot(p, vh, preferred_element_type=jnp.float32)          # (S, Dh)
            part = jnp.dot(ctx.astype(jnp.bfloat16),
                           wo[hh * Dh:(hh + 1) * Dh, :],
                           preferred_element_type=jnp.float32)                # (S, H)
            attn = part if attn is None else attn + part
        attn_out = attn + bo_ref[layer]

        # --- residual + LayerNorm
        h1 = _ln(attn_out + h, ln1g_ref[layer], ln1b_ref[layer])

        # --- FFN (gelu) + residual + LayerNorm
        inter = jnp.dot(h1.astype(jnp.bfloat16), wi,
                        preferred_element_type=jnp.float32) + bi_ref[layer]
        inter = _gelu(inter)
        ffn = jnp.dot(inter.astype(jnp.bfloat16), wout,
                      preferred_element_type=jnp.float32) + bout_ref[layer]
        h = _ln(ffn + h1, ln2g_ref[layer], ln2b_ref[layer])

    o_ref[...] = h.astype(o_ref.dtype)


def encoder_fused(x, pad_bias, params):
    """x: (B, S, H) summed embeddings; pad_bias: (B, 1, S) additive key bias."""
    B, S, H = x.shape
    L, I = NUM_LAYERS, INTERMEDIATE

    def full(shape):
        zeros = (0,) * len(shape)
        return pl.BlockSpec(shape, lambda b: zeros)          # resident, no per-step refetch

    def per_batch(shape):
        zeros = (0,) * len(shape)
        return pl.BlockSpec((None,) + shape, lambda b: (b,) + zeros)

    return pl.pallas_call(
        _encoder_kernel,
        out_shape=jax.ShapeDtypeStruct((B, S, H), jnp.float32),
        grid=(B,),
        in_specs=[
            per_batch((S, H)),            # x (embedding sum), one batch per step
            per_batch((1, S)),            # per-batch additive key-padding bias
            full((1, H)),                 # emb LN gamma
            full((1, H)),                 # emb LN beta
            full((L, H, 3 * H)),          # wqkv (stacked, bf16)
            full((L, 1, 3 * H)),          # bqkv
            full((L, H, H)),              # wo (bf16)
            full((L, 1, H)),              # bo
            full((L, 1, H)),              # ln1 gamma
            full((L, 1, H)),              # ln1 beta
            full((L, H, I)),              # wi (bf16)
            full((L, 1, I)),              # bi
            full((L, I, H)),              # wout (bf16)
            full((L, 1, H)),              # bout
            full((L, 1, H)),              # ln2 gamma
            full((L, 1, H)),              # ln2 beta
        ],
        out_specs=per_batch((S, H)),
        compiler_params=pltpu.CompilerParams(
            dimension_semantics=("parallel",)),   # batches independent -> both TCs on v7x
    )(x, pad_bias,
      params["emb_ln_g"], params["emb_ln_b"],
      params["wqkv"], params["bqkv"],
      params["wo"], params["bo"],
      params["ln1_g"], params["ln1_b"],
      params["wi"], params["bi"],
      params["wout"], params["bout"],
      params["ln2_g"], params["ln2_b"])


# ----------------------------------------------------------------------------
# Deterministic parameter init (stacked per-layer weights, fused QKV, bf16
# matmul weights, softmax scale folded into Wq/bq)
# ----------------------------------------------------------------------------
def init_params(key):
    def nrm(k, shape, scale=0.02):
        return (scale * jax.random.normal(k, shape)).astype(jnp.float32)

    ks = jax.random.split(key, 8)
    L, H, I = NUM_LAYERS, HIDDEN, INTERMEDIATE

    wqkv = nrm(ks[4], (L, H, 3 * H))
    bqkv = jnp.zeros((L, 1, 3 * H), jnp.float32)
    # Fold the 1/sqrt(head_dim) attention scale into the Q projection once.
    inv_sqrt_dh = 1.0 / (HEAD_DIM ** 0.5)
    wqkv = wqkv.at[:, :, :H].multiply(inv_sqrt_dh)
    bqkv = bqkv.at[:, :, :H].multiply(inv_sqrt_dh)

    return {
        "word_emb": nrm(ks[0], (VOCAB_SIZE, H)),
        "pos_emb": nrm(ks[1], (MAX_POS, H)),
        "tok_emb": nrm(ks[2], (TYPE_VOCAB, H)),
        "emb_ln_g": jnp.ones((1, H), jnp.float32),
        "emb_ln_b": jnp.zeros((1, H), jnp.float32),
        "pool_w": nrm(ks[3], (H, H)),
        "pool_b": jnp.zeros((H,), jnp.float32),
        # stacked encoder weights (leading layer axis); matmul weights in bf16
        "wqkv": wqkv.astype(jnp.bfloat16),
        "bqkv": bqkv,
        "wo": nrm(ks[5], (L, H, H)).astype(jnp.bfloat16),
        "bo": jnp.zeros((L, 1, H), jnp.float32),
        "ln1_g": jnp.ones((L, 1, H), jnp.float32),
        "ln1_b": jnp.zeros((L, 1, H), jnp.float32),
        "wi": nrm(ks[6], (L, H, I)).astype(jnp.bfloat16),
        "bi": jnp.zeros((L, 1, I), jnp.float32),
        "wout": nrm(ks[7], (L, I, H)).astype(jnp.bfloat16),
        "bout": jnp.zeros((L, 1, H), jnp.float32),
        "ln2_g": jnp.ones((L, 1, H), jnp.float32),
        "ln2_b": jnp.zeros((L, 1, H), jnp.float32),
    }


# ----------------------------------------------------------------------------
# BERT forward (mirrors BERT.forward: embeddings -> encoder -> pooler)
# ----------------------------------------------------------------------------
def bert_forward(params, input_ids, segment_ids, attention_mask):
    B, S = input_ids.shape
    H = HIDDEN

    # --- BertEmbedding: word + position + segment lookup (XLA gathers; the
    # adds fuse into the gather output feeding the single encoder kernel).
    # Dropout is identity at inference.
    we = params["word_emb"][input_ids]                       # (B, S, H)
    pe = params["pos_emb"][jnp.arange(S)][None, :, :]        # (1, S, H)
    te = params["tok_emb"][segment_ids]                      # (B, S, H)
    x = (we + pe + te).astype(jnp.float32)                   # (B, S, H)

    # --- O(B*S) additive key-padding bias; the (S, S) mask is formed in-kernel
    # by broadcasting this row over queries (no (M, M) slab in HBM/VMEM).
    pad_bias = ((1.0 - attention_mask.astype(jnp.float32)) * -10000.0).reshape(B, 1, S)

    # --- fused encoder (embedding LN + all transformer layers in one kernel)
    embeddings = encoder_fused(x, pad_bias, params)          # (B, S, H)

    # --- Pooler on embeddings[:1, :1, :] (dense + tanh), plain jnp (tiny).
    pooled_in = embeddings[:1, :1, :].reshape(1, H)
    pooled = jnp.tanh(pooled_in @ params["pool_w"] + params["pool_b"]).reshape(1, 1, H)

    # return (embeddings, pooled_output + embeddings[1:])  -- broadcast add
    return embeddings, pooled + embeddings[1:]


# ----------------------------------------------------------------------------
if __name__ == "__main__":
    key = jax.random.PRNGKey(0)
    pkey, ikey, skey = jax.random.split(key, 3)

    params = init_params(pkey)

    B, S = 2, 8
    input_ids = jax.random.randint(ikey, (B, S), 0, VOCAB_SIZE, dtype=jnp.int32)
    segment_ids = jax.random.randint(skey, (B, S), 0, TYPE_VOCAB, dtype=jnp.int32)
    attention_mask = jnp.ones((B, S), dtype=jnp.int32)

    embeddings, combined = jax.jit(bert_forward)(params, input_ids, segment_ids, attention_mask)
    jax.block_until_ready((embeddings, combined))

    assert embeddings.shape == (B, S, HIDDEN)
    assert combined.shape == (B - 1, S, HIDDEN)
    assert bool(jnp.all(jnp.isfinite(embeddings))) and bool(jnp.all(jnp.isfinite(combined)))
    print("KERNEL_OK")
</pallas_src>

<mosaic_0001>
module attributes {stable_mosaic.version = 11 : i64} {
  func.func @_encoder_kernel(%arg0: i32, %arg1: memref<1x8x32xf32, #tpu.memory_space<vmem>>, %arg2: memref<1x1x8xf32, #tpu.memory_space<vmem>>, %arg3: memref<1x32xf32, #tpu.memory_space<vmem>>, %arg4: memref<1x32xf32, #tpu.memory_space<vmem>>, %arg5: memref<2x32x96xbf16, #tpu.memory_space<vmem>>, %arg6: memref<2x1x96xf32, #tpu.memory_space<vmem>>, %arg7: memref<2x32x32xbf16, #tpu.memory_space<vmem>>, %arg8: memref<2x1x32xf32, #tpu.memory_space<vmem>>, %arg9: memref<2x1x32xf32, #tpu.memory_space<vmem>>, %arg10: memref<2x1x32xf32, #tpu.memory_space<vmem>>, %arg11: memref<2x32x64xbf16, #tpu.memory_space<vmem>>, %arg12: memref<2x1x64xf32, #tpu.memory_space<vmem>>, %arg13: memref<2x64x32xbf16, #tpu.memory_space<vmem>>, %arg14: memref<2x1x32xf32, #tpu.memory_space<vmem>>, %arg15: memref<2x1x32xf32, #tpu.memory_space<vmem>>, %arg16: memref<2x1x32xf32, #tpu.memory_space<vmem>>, %arg17: memref<1x8x32xf32, #tpu.memory_space<vmem>>) attributes {dimension_semantics = [#tpu.dimension_semantics<parallel>], iteration_bounds = array<i64: 2>, scalar_prefetch = 0 : i64, scratch_operands = 0 : i64, tpu.core_type = #tpu.core_type<tc>, window_params = [{transform_indices = @transform_0, window_bounds = array<i64: 1, 8, 32>}, {transform_indices = @transform_1, window_bounds = array<i64: 1, 1, 8>}, {pipeline_mode = #tpu.pipeline_mode<synchronous>, transform_indices = @transform_2, window_bounds = array<i64: 1, 32>}, {pipeline_mode = #tpu.pipeline_mode<synchronous>, transform_indices = @transform_3, window_bounds = array<i64: 1, 32>}, {pipeline_mode = #tpu.pipeline_mode<synchronous>, transform_indices = @transform_4, window_bounds = array<i64: 2, 32, 96>}, {pipeline_mode = #tpu.pipeline_mode<synchronous>, transform_indices = @transform_5, window_bounds = array<i64: 2, 1, 96>}, {pipeline_mode = #tpu.pipeline_mode<synchronous>, transform_indices = @transform_6, window_bounds = array<i64: 2, 32, 32>}, {pipeline_mode = #tpu.pipeline_mode<synchronous>, transform_indices = @transform_7, window_bounds = array<i64: 2, 1, 32>}, {pipeline_mode = #tpu.pipeline_mode<synchronous>, transform_indices = @transform_8, window_bounds = array<i64: 2, 1, 32>}, {pipeline_mode = #tpu.pipeline_mode<synchronous>, transform_indices = @transform_9, window_bounds = array<i64: 2, 1, 32>}, {pipeline_mode = #tpu.pipeline_mode<synchronous>, transform_indices = @transform_10, window_bounds = array<i64: 2, 32, 64>}, {pipeline_mode = #tpu.pipeline_mode<synchronous>, transform_indices = @transform_11, window_bounds = array<i64: 2, 1, 64>}, {pipeline_mode = #tpu.pipeline_mode<synchronous>, transform_indices = @transform_12, window_bounds = array<i64: 2, 64, 32>}, {pipeline_mode = #tpu.pipeline_mode<synchronous>, transform_indices = @transform_13, window_bounds = array<i64: 2, 1, 32>}, {pipeline_mode = #tpu.pipeline_mode<synchronous>, transform_indices = @transform_14, window_bounds = array<i64: 2, 1, 32>}, {pipeline_mode = #tpu.pipeline_mode<synchronous>, transform_indices = @transform_15, window_bounds = array<i64: 2, 1, 32>}, {transform_indices = @transform_16, window_bounds = array<i64: 1, 8, 32>}]} {
    %c0 = arith.constant 0 : index
    %c0_0 = arith.constant 0 : index
    %c0_1 = arith.constant 0 : index
    %0 = vector.load %arg2[%c0, %c0_0, %c0_1] : memref<1x1x8xf32, #tpu.memory_space<vmem>>, vector<1x1x8xf32>
    %1 = vector.shape_cast %0 : vector<1x1x8xf32> to vector<1x8xf32>
    %c0_2 = arith.constant 0 : index
    %c0_3 = arith.constant 0 : index
    %c0_4 = arith.constant 0 : index
    %2 = vector.load %arg1[%c0_2, %c0_3, %c0_4] : memref<1x8x32xf32, #tpu.memory_space<vmem>>, vector<1x8x32xf32>
    %3 = vector.shape_cast %2 : vector<1x8x32xf32> to vector<8x32xf32>
    %c0_5 = arith.constant 0 : index
    %c0_6 = arith.constant 0 : index
    %4 = vector.load %arg3[%c0_5, %c0_6] : memref<1x32xf32, #tpu.memory_space<vmem>>, vector<1x32xf32>
    %c0_7 = arith.constant 0 : index
    %c0_8 = arith.constant 0 : index
    %5 = vector.load %arg4[%c0_7, %c0_8] : memref<1x32xf32, #tpu.memory_space<vmem>>, vector<1x32xf32>
    %cst = arith.constant dense<0.000000e+00> : vector<8xf32>
    %6 = vector.multi_reduction <add>, %3, %cst [1] : vector<8x32xf32> to vector<8xf32>
    %7 = vector.shape_cast %6 : vector<8xf32> to vector<8x1xf32>
    %cst_9 = arith.constant 3.200000e+01 : f32
    %8 = vector.broadcast %cst_9 : f32 to vector<8x1xf32>
    %9 = arith.divf %7, %8 : vector<8x1xf32>
    %10 = vector.broadcast %9 : vector<8x1xf32> to vector<8x32xf32>
    %11 = arith.subf %3, %10 : vector<8x32xf32>
    %12 = arith.mulf %11, %11 : vector<8x32xf32>
    %cst_10 = arith.constant dense<0.000000e+00> : vector<8xf32>
    %13 = vector.multi_reduction <add>, %12, %cst_10 [1] : vector<8x32xf32> to vector<8xf32>
    %14 = vector.shape_cast %13 : vector<8xf32> to vector<8x1xf32>
    %cst_11 = arith.constant 3.200000e+01 : f32
    %15 = vector.broadcast %cst_11 : f32 to vector<8x1xf32>
    %16 = arith.divf %14, %15 : vector<8x1xf32>
    %cst_12 = arith.constant 9.99999996E-13 : f32
    %17 = vector.broadcast %cst_12 : f32 to vector<8x1xf32>
    %18 = arith.addf %16, %17 : vector<8x1xf32>
    %19 = math.rsqrt %18 : vector<8x1xf32>
    %20 = vector.broadcast %19 : vector<8x1xf32> to vector<8x32xf32>
    %21 = arith.mulf %11, %20 : vector<8x32xf32>
    %22 = vector.broadcast %4 : vector<1x32xf32> to vector<8x32xf32>
    %23 = arith.mulf %21, %22 : vector<8x32xf32>
    %24 = vector.broadcast %5 : vector<1x32xf32> to vector<8x32xf32>
    %25 = arith.addf %23, %24 : vector<8x32xf32>
    %c0_13 = arith.constant 0 : index
    %c0_14 = arith.constant 0 : index
    %c0_15 = arith.constant 0 : index
    %26 = vector.load %arg5[%c0_13, %c0_14, %c0_15] : memref<2x32x96xbf16, #tpu.memory_space<vmem>>, vector<1x32x96xbf16>
    %27 = vector.shape_cast %26 : vector<1x32x96xbf16> to vector<32x96xbf16>
    %c0_16 = arith.constant 0 : index
    %c0_17 = arith.constant 0 : index
    %c0_18 = arith.constant 0 : index
    %28 = vector.load %arg7[%c0_16, %c0_17, %c0_18] : memref<2x32x32xbf16, #tpu.memory_space<vmem>>, vector<1x32x32xbf16>
    %29 = vector.shape_cast %28 : vector<1x32x32xbf16> to vector<32x32xbf16>
    %c0_19 = arith.constant 0 : index
    %c0_20 = arith.constant 0 : index
    %c0_21 = arith.constant 0 : index
    %30 = vector.load %arg11[%c0_19, %c0_20, %c0_21] : memref<2x32x64xbf16, #tpu.memory_space<vmem>>, vector<1x32x64xbf16>
    %31 = vector.shape_cast %30 : vector<1x32x64xbf16> to vector<32x64xbf16>
    %c0_22 = arith.constant 0 : index
    %c0_23 = arith.constant 0 : index
    %c0_24 = arith.constant 0 : index
    %32 = vector.load %arg13[%c0_22, %c0_23, %c0_24] : memref<2x64x32xbf16, #tpu.memory_space<vmem>>, vector<1x64x32xbf16>
    %33 = vector.shape_cast %32 : vector<1x64x32xbf16> to vector<64x32xbf16>
    %34 = arith.truncf %25 : vector<8x32xf32> to vector<8x32xbf16>
    %cst_25 = arith.constant dense<0.000000e+00> : vector<8x96xf32>
    %35 = tpu.matmul %34, %27, %cst_25 {dimension_numbers = #tpu.dot_dimension_numbers<[1], [0], [0], [1], [0, 0, 1, 1], [], []>} : vector<8x32xbf16>, vector<32x96xbf16>, vector<8x96xf32> -> vector<8x96xf32>
    %c0_26 = arith.constant 0 : index
    %c0_27 = arith.constant 0 : index
    %c0_28 = arith.constant 0 : index
    %36 = vector.load %arg6[%c0_26, %c0_27, %c0_28] : memref<2x1x96xf32, #tpu.memory_space<vmem>>, vector<1x1x96xf32>
    %37 = vector.shape_cast %36 : vector<1x1x96xf32> to vector<1x96xf32>
    %38 = vector.broadcast %37 : vector<1x96xf32> to vector<8x96xf32>
    %39 = arith.addf %35, %38 : vector<8x96xf32>
    %40 = vector.extract_strided_slice %39 {offsets = [0, 0], sizes = [8, 8], strides = [1, 1]} : vector<8x96xf32> to vector<8x8xf32>
    %41 = vector.extract_strided_slice %39 {offsets = [0, 32], sizes = [8, 8], strides = [1, 1]} : vector<8x96xf32> to vector<8x8xf32>
    %42 = vector.extract_strided_slice %39 {offsets = [0, 64], sizes = [8, 8], strides = [1, 1]} : vector<8x96xf32> to vector<8x8xf32>
    %cst_29 = arith.constant dense<0.000000e+00> : vector<8x8xf32>
    %43 = tpu.matmul %40, %41, %cst_29 {dimension_numbers = #tpu.dot_dimension_numbers<[1], [1], [0], [0], [0, 0, 1, 0], [], []>} : vector<8x8xf32>, vector<8x8xf32>, vector<8x8xf32> -> vector<8x8xf32>
    %44 = vector.broadcast %1 : vector<1x8xf32> to vector<8x8xf32>
    %45 = arith.addf %43, %44 : vector<8x8xf32>
    %cst_30 = arith.constant dense<0xFF800000> : vector<8xf32>
    %46 = vector.multi_reduction <maximumf>, %45, %cst_30 [1] : vector<8x8xf32> to vector<8xf32>
    %47 = vector.shape_cast %46 : vector<8xf32> to vector<8x1xf32>
    %48 = vector.broadcast %47 : vector<8x1xf32> to vector<8x8xf32>
    %49 = arith.subf %45, %48 : vector<8x8xf32>
    %50 = math.exp %49 : vector<8x8xf32>
    %cst_31 = arith.constant dense<0.000000e+00> : vector<8xf32>
    %51 = vector.multi_reduction <add>, %50, %cst_31 [1] : vector<8x8xf32> to vector<8xf32>
    %52 = vector.shape_cast %51 : vector<8xf32> to vector<8x1xf32>
    %53 = tpu.reciprocal %52 {approx = true} : vector<8x1xf32> -> vector<8x1xf32>
    %54 = vector.broadcast %53 : vector<8x1xf32> to vector<8x8xf32>
    %55 = arith.mulf %50, %54 : vector<8x8xf32>
    %cst_32 = arith.constant dense<0.000000e+00> : vector<8x8xf32>
    %56 = tpu.matmul %55, %42, %cst_32 {dimension_numbers = #tpu.dot_dimension_numbers<[1], [0], [0], [1], [0, 0, 1, 1], [], []>} : vector<8x8xf32>, vector<8x8xf32>, vector<8x8xf32> -> vector<8x8xf32>
    %57 = arith.truncf %56 : vector<8x8xf32> to vector<8x8xbf16>
    %58 = vector.extract_strided_slice %29 {offsets = [0, 0], sizes = [8, 32], strides = [1, 1]} : vector<32x32xbf16> to vector<8x32xbf16>
    %cst_33 = arith.constant dense<0.000000e+00> : vector<8x32xf32>
    %59 = tpu.matmul %57, %58, %cst_33 {dimension_numbers = #tpu.dot_dimension_numbers<[1], [0], [0], [1], [0, 0, 1, 1], [], []>} : vector<8x8xbf16>, vector<8x32xbf16>, vector<8x32xf32> -> vector<8x32xf32>
    %60 = vector.extract_strided_slice %39 {offsets = [0, 8], sizes = [8, 8], strides = [1, 1]} : vector<8x96xf32> to vector<8x8xf32>
    %61 = vector.extract_strided_slice %39 {offsets = [0, 40], sizes = [8, 8], strides = [1, 1]} : vector<8x96xf32> to vector<8x8xf32>
    %62 = vector.extract_strided_slice %39 {offsets = [0, 72], sizes = [8, 8], strides = [1, 1]} : vector<8x96xf32> to vector<8x8xf32>
    %cst_34 = arith.constant dense<0.000000e+00> : vector<8x8xf32>
    %63 = tpu.matmul %60, %61, %cst_34 {dimension_numbers = #tpu.dot_dimension_numbers<[1], [1], [0], [0], [0, 0, 1, 0], [], []>} : vector<8x8xf32>, vector<8x8xf32>, vector<8x8xf32> -> vector<8x8xf32>
    %64 = vector.broadcast %1 : vector<1x8xf32> to vector<8x8xf32>
    %65 = arith.addf %63, %64 : vector<8x8xf32>
    %cst_35 = arith.constant dense<0xFF800000> : vector<8xf32>
    %66 = vector.multi_reduction <maximumf>, %65, %cst_35 [1] : vector<8x8xf32> to vector<8xf32>
    %67 = vector.shape_cast %66 : vector<8xf32> to vector<8x1xf32>
    %68 = vector.broadcast %67 : vector<8x1xf32> to vector<8x8xf32>
    %69 = arith.subf %65, %68 : vector<8x8xf32>
    %70 = math.exp %69 : vector<8x8xf32>
    %cst_36 = arith.constant dense<0.000000e+00> : vector<8xf32>
    %71 = vector.multi_reduction <add>, %70, %cst_36 [1] : vector<8x8xf32> to vector<8xf32>
    %72 = vector.shape_cast %71 : vector<8xf32> to vector<8x1xf32>
    %73 = tpu.reciprocal %72 {approx = true} : vector<8x1xf32> -> vector<8x1xf32>
    %74 = vector.broadcast %73 : vector<8x1xf32> to vector<8x8xf32>
    %75 = arith.mulf %70, %74 : vector<8x8xf32>
    %cst_37 = arith.constant dense<0.000000e+00> : vector<8x8xf32>
    %76 = tpu.matmul %75, %62, %cst_37 {dimension_numbers = #tpu.dot_dimension_numbers<[1], [0], [0], [1], [0, 0, 1, 1], [], []>} : vector<8x8xf32>, vector<8x8xf32>, vector<8x8xf32> -> vector<8x8xf32>
    %77 = arith.truncf %76 : vector<8x8xf32> to vector<8x8xbf16>
    %78 = vector.extract_strided_slice %29 {offsets = [8, 0], sizes = [8, 32], strides = [1, 1]} : vector<32x32xbf16> to vector<8x32xbf16>
    %cst_38 = arith.constant dense<0.000000e+00> : vector<8x32xf32>
    %79 = tpu.matmul %77, %78, %cst_38 {dimension_numbers = #tpu.dot_dimension_numbers<[1], [0], [0], [1], [0, 0, 1, 1], [], []>} : vector<8x8xbf16>, vector<8x32xbf16>, vector<8x32xf32> -> vector<8x32xf32>
    %80 = arith.addf %59, %79 : vector<8x32xf32>
    %81 = vector.extract_strided_slice %39 {offsets = [0, 16], sizes = [8, 8], strides = [1, 1]} : vector<8x96xf32> to vector<8x8xf32>
    %82 = vector.extract_strided_slice %39 {offsets = [0, 48], sizes = [8, 8], strides = [1, 1]} : vector<8x96xf32> to vector<8x8xf32>
    %83 = vector.extract_strided_slice %39 {offsets = [0, 80], sizes = [8, 8], strides = [1, 1]} : vector<8x96xf32> to vector<8x8xf32>
    %cst_39 = arith.constant dense<0.000000e+00> : vector<8x8xf32>
    %84 = tpu.matmul %81, %82, %cst_39 {dimension_numbers = #tpu.dot_dimension_numbers<[1], [1], [0], [0], [0, 0, 1, 0], [], []>} : vector<8x8xf32>, vector<8x8xf32>, vector<8x8xf32> -> vector<8x8xf32>
    %85 = vector.broadcast %1 : vector<1x8xf32> to vector<8x8xf32>
    %86 = arith.addf %84, %85 : vector<8x8xf32>
    %cst_40 = arith.constant dense<0xFF800000> : vector<8xf32>
    %87 = vector.multi_reduction <maximumf>, %86, %cst_40 [1] : vector<8x8xf32> to vector<8xf32>
    %88 = vector.shape_cast %87 : vector<8xf32> to vector<8x1xf32>
    %89 = vector.broadcast %88 : vector<8x1xf32> to vector<8x8xf32>
    %90 = arith.subf %86, %89 : vector<8x8xf32>
    %91 = math.exp %90 : vector<8x8xf32>
    %cst_41 = arith.constant dense<0.000000e+00> : vector<8xf32>
    %92 = vector.multi_reduction <add>, %91, %cst_41 [1] : vector<8x8xf32> to vector<8xf32>
    %93 = vector.shape_cast %92 : vector<8xf32> to vector<8x1xf32>
    %94 = tpu.reciprocal %93 {approx = true} : vector<8x1xf32> -> vector<8x1xf32>
    %95 = vector.broadcast %94 : vector<8x1xf32> to vector<8x8xf32>
    %96 = arith.mulf %91, %95 : vector<8x8xf32>
    %cst_42 = arith.constant dense<0.000000e+00> : vector<8x8xf32>
    %97 = tpu.matmul %96, %83, %cst_42 {dimension_numbers = #tpu.dot_dimension_numbers<[1], [0], [0], [1], [0, 0, 1, 1], [], []>} : vector<8x8xf32>, vector<8x8xf32>, vector<8x8xf32> -> vector<8x8xf32>
    %98 = arith.truncf %97 : vector<8x8xf32> to vector<8x8xbf16>
    %99 = vector.extract_strided_slice %29 {offsets = [16, 0], sizes = [8, 32], strides = [1, 1]} : vector<32x32xbf16> to vector<8x32xbf16>
    %cst_43 = arith.constant dense<0.000000e+00> : vector<8x32xf32>
    %100 = tpu.matmul %98, %99, %cst_43 {dimension_numbers = #tpu.dot_dimension_numbers<[1], [0], [0], [1], [0, 0, 1, 1], [], []>} : vector<8x8xbf16>, vector<8x32xbf16>, vector<8x32xf32> -> vector<8x32xf32>
    %101 = arith.addf %80, %100 : vector<8x32xf32>
    %102 = vector.extract_strided_slice %39 {offsets = [0, 24], sizes = [8, 8], strides = [1, 1]} : vector<8x96xf32> to vector<8x8xf32>
    %103 = vector.extract_strided_slice %39 {offsets = [0, 56], sizes = [8, 8], strides = [1, 1]} : vector<8x96xf32> to vector<8x8xf32>
    %104 = vector.extract_strided_slice %39 {offsets = [0, 88], sizes = [8, 8], strides = [1, 1]} : vector<8x96xf32> to vector<8x8xf32>
    %cst_44 = arith.constant dense<0.000000e+00> : vector<8x8xf32>
    %105 = tpu.matmul %102, %103, %cst_44 {dimension_numbers = #tpu.dot_dimension_numbers<[1], [1], [0], [0], [0, 0, 1, 0], [], []>} : vector<8x8xf32>, vector<8x8xf32>, vector<8x8xf32> -> vector<8x8xf32>
    %106 = vector.broadcast %1 : vector<1x8xf32> to vector<8x8xf32>
    %107 = arith.addf %105, %106 : vector<8x8xf32>
    %cst_45 = arith.constant dense<0xFF800000> : vector<8xf32>
    %108 = vector.multi_reduction <maximumf>, %107, %cst_45 [1] : vector<8x8xf32> to vector<8xf32>
    %109 = vector.shape_cast %108 : vector<8xf32> to vector<8x1xf32>
    %110 = vector.broadcast %109 : vector<8x1xf32> to vector<8x8xf32>
    %111 = arith.subf %107, %110 : vector<8x8xf32>
    %112 = math.exp %111 : vector<8x8xf32>
    %cst_46 = arith.constant dense<0.000000e+00> : vector<8xf32>
    %113 = vector.multi_reduction <add>, %112, %cst_46 [1] : vector<8x8xf32> to vector<8xf32>
    %114 = vector.shape_cast %113 : vector<8xf32> to vector<8x1xf32>
    %115 = tpu.reciprocal %114 {approx = true} : vector<8x1xf32> -> vector<8x1xf32>
    %116 = vector.broadcast %115 : vector<8x1xf32> to vector<8x8xf32>
    %117 = arith.mulf %112, %116 : vector<8x8xf32>
    %cst_47 = arith.constant dense<0.000000e+00> : vector<8x8xf32>
    %118 = tpu.matmul %117, %104, %cst_47 {dimension_numbers = #tpu.dot_dimension_numbers<[1], [0], [0], [1], [0, 0, 1, 1], [], []>} : vector<8x8xf32>, vector<8x8xf32>, vector<8x8xf32> -> vector<8x8xf32>
    %119 = arith.truncf %118 : vector<8x8xf32> to vector<8x8xbf16>
    %120 = vector.extract_strided_slice %29 {offsets = [24, 0], sizes = [8, 32], strides = [1, 1]} : vector<32x32xbf16> to vector<8x32xbf16>
    %cst_48 = arith.constant dense<0.000000e+00> : vector<8x32xf32>
    %121 = tpu.matmul %119, %120, %cst_48 {dimension_numbers = #tpu.dot_dimension_numbers<[1], [0], [0], [1], [0, 0, 1, 1], [], []>} : vector<8x8xbf16>, vector<8x32xbf16>, vector<8x32xf32> -> vector<8x32xf32>
    %122 = arith.addf %101, %121 : vector<8x32xf32>
    %c0_49 = arith.constant 0 : index
    %c0_50 = arith.constant 0 : index
    %c0_51 = arith.constant 0 : index
    %123 = vector.load %arg8[%c0_49, %c0_50, %c0_51] : memref<2x1x32xf32, #tpu.memory_space<vmem>>, vector<1x1x32xf32>
    %124 = vector.shape_cast %123 : vector<1x1x32xf32> to vector<1x32xf32>
    %125 = vector.broadcast %124 : vector<1x32xf32> to vector<8x32xf32>
    %126 = arith.addf %122, %125 : vector<8x32xf32>
    %127 = arith.addf %126, %25 : vector<8x32xf32>
    %c0_52 = arith.constant 0 : index
    %c0_53 = arith.constant 0 : index
    %c0_54 = arith.constant 0 : index
    %128 = vector.load %arg9[%c0_52, %c0_53, %c0_54] : memref<2x1x32xf32, #tpu.memory_space<vmem>>, vector<1x1x32xf32>
    %129 = vector.shape_cast %128 : vector<1x1x32xf32> to vector<1x32xf32>
    %c0_55 = arith.constant 0 : index
    %c0_56 = arith.constant 0 : index
    %c0_57 = arith.constant 0 : index
    %130 = vector.load %arg10[%c0_55, %c0_56, %c0_57] : memref<2x1x32xf32, #tpu.memory_space<vmem>>, vector<1x1x32xf32>
    %131 = vector.shape_cast %130 : vector<1x1x32xf32> to vector<1x32xf32>
    %cst_58 = arith.constant dense<0.000000e+00> : vector<8xf32>
    %132 = vector.multi_reduction <add>, %127, %cst_58 [1] : vector<8x32xf32> to vector<8xf32>
    %133 = vector.shape_cast %132 : vector<8xf32> to vector<8x1xf32>
    %cst_59 = arith.constant 3.200000e+01 : f32
    %134 = vector.broadcast %cst_59 : f32 to vector<8x1xf32>
    %135 = arith.divf %133, %134 : vector<8x1xf32>
    %136 = vector.broadcast %135 : vector<8x1xf32> to vector<8x32xf32>
    %137 = arith.subf %127, %136 : vector<8x32xf32>
    %138 = arith.mulf %137, %137 : vector<8x32xf32>
    %cst_60 = arith.constant dense<0.000000e+00> : vector<8xf32>
    %139 = vector.multi_reduction <add>, %138, %cst_60 [1] : vector<8x32xf32> to vector<8xf32>
    %140 = vector.shape_cast %139 : vector<8xf32> to vector<8x1xf32>
    %cst_61 = arith.constant 3.200000e+01 : f32
    %141 = vector.broadcast %cst_61 : f32 to vector<8x1xf32>
    %142 = arith.divf %140, %141 : vector<8x1xf32>
    %cst_62 = arith.constant 9.99999996E-13 : f32
    %143 = vector.broadcast %cst_62 : f32 to vector<8x1xf32>
    %144 = arith.addf %142, %143 : vector<8x1xf32>
    %145 = math.rsqrt %144 : vector<8x1xf32>
    %146 = vector.broadcast %145 : vector<8x1xf32> to vector<8x32xf32>
    %147 = arith.mulf %137, %146 : vector<8x32xf32>
    %148 = vector.broadcast %129 : vector<1x32xf32> to vector<8x32xf32>
    %149 = arith.mulf %147, %148 : vector<8x32xf32>
    %150 = vector.broadcast %131 : vector<1x32xf32> to vector<8x32xf32>
    %151 = arith.addf %149, %150 : vector<8x32xf32>
    %152 = arith.truncf %151 : vector<8x32xf32> to vector<8x32xbf16>
    %cst_63 = arith.constant dense<0.000000e+00> : vector<8x64xf32>
    %153 = tpu.matmul %152, %31, %cst_63 {dimension_numbers = #tpu.dot_dimension_numbers<[1], [0], [0], [1], [0, 0, 1, 1], [], []>} : vector<8x32xbf16>, vector<32x64xbf16>, vector<8x64xf32> -> vector<8x64xf32>
    %c0_64 = arith.constant 0 : index
    %c0_65 = arith.constant 0 : index
    %c0_66 = arith.constant 0 : index
    %154 = vector.load %arg12[%c0_64, %c0_65, %c0_66] : memref<2x1x64xf32, #tpu.memory_space<vmem>>, vector<1x1x64xf32>
    %155 = vector.shape_cast %154 : vector<1x1x64xf32> to vector<1x64xf32>
    %156 = vector.broadcast %155 : vector<1x64xf32> to vector<8x64xf32>
    %157 = arith.addf %153, %156 : vector<8x64xf32>
    %cst_67 = arith.constant 5.000000e-01 : f32
    %158 = vector.broadcast %cst_67 : f32 to vector<8x64xf32>
    %159 = arith.mulf %158, %157 : vector<8x64xf32>
    %cst_68 = arith.constant 4.471500e-02 : f32
    %160 = vector.broadcast %cst_68 : f32 to vector<8x64xf32>
    %161 = arith.mulf %160, %157 : vector<8x64xf32>
    %162 = arith.mulf %161, %157 : vector<8x64xf32>
    %163 = arith.mulf %162, %157 : vector<8x64xf32>
    %164 = arith.addf %157, %163 : vector<8x64xf32>
    %cst_69 = arith.constant 0.797884583 : f32
    %165 = vector.broadcast %cst_69 : f32 to vector<8x64xf32>
    %166 = arith.mulf %165, %164 : vector<8x64xf32>
    %167 = math.tanh %166 : vector<8x64xf32>
    %cst_70 = arith.constant 1.000000e+00 : f32
    %168 = vector.broadcast %cst_70 : f32 to vector<8x64xf32>
    %169 = arith.addf %168, %167 : vector<8x64xf32>
    %170 = arith.mulf %159, %169 : vector<8x64xf32>
    %171 = arith.truncf %170 : vector<8x64xf32> to vector<8x64xbf16>
    %cst_71 = arith.constant dense<0.000000e+00> : vector<8x32xf32>
    %172 = tpu.matmul %171, %33, %cst_71 {dimension_numbers = #tpu.dot_dimension_numbers<[1], [0], [0], [1], [0, 0, 1, 1], [], []>} : vector<8x64xbf16>, vector<64x32xbf16>, vector<8x32xf32> -> vector<8x32xf32>
    %c0_72 = arith.constant 0 : index
    %c0_73 = arith.constant 0 : index
    %c0_74 = arith.constant 0 : index
    %173 = vector.load %arg14[%c0_72, %c0_73, %c0_74] : memref<2x1x32xf32, #tpu.memory_space<vmem>>, vector<1x1x32xf32>
    %174 = vector.shape_cast %173 : vector<1x1x32xf32> to vector<1x32xf32>
    %175 = vector.broadcast %174 : vector<1x32xf32> to vector<8x32xf32>
    %176 = arith.addf %172, %175 : vector<8x32xf32>
    %177 = arith.addf %176, %151 : vector<8x32xf32>
    %c0_75 = arith.constant 0 : index
    %c0_76 = arith.constant 0 : index
    %c0_77 = arith.constant 0 : index
    %178 = vector.load %arg15[%c0_75, %c0_76, %c0_77] : memref<2x1x32xf32, #tpu.memory_space<vmem>>, vector<1x1x32xf32>
    %179 = vector.shape_cast %178 : vector<1x1x32xf32> to vector<1x32xf32>
    %c0_78 = arith.constant 0 : index
    %c0_79 = arith.constant 0 : index
    %c0_80 = arith.constant 0 : index
    %180 = vector.load %arg16[%c0_78, %c0_79, %c0_80] : memref<2x1x32xf32, #tpu.memory_space<vmem>>, vector<1x1x32xf32>
    %181 = vector.shape_cast %180 : vector<1x1x32xf32> to vector<1x32xf32>
    %cst_81 = arith.constant dense<0.000000e+00> : vector<8xf32>
    %182 = vector.multi_reduction <add>, %177, %cst_81 [1] : vector<8x32xf32> to vector<8xf32>
    %183 = vector.shape_cast %182 : vector<8xf32> to vector<8x1xf32>
    %cst_82 = arith.constant 3.200000e+01 : f32
    %184 = vector.broadcast %cst_82 : f32 to vector<8x1xf32>
    %185 = arith.divf %183, %184 : vector<8x1xf32>
    %186 = vector.broadcast %185 : vector<8x1xf32> to vector<8x32xf32>
    %187 = arith.subf %177, %186 : vector<8x32xf32>
    %188 = arith.mulf %187, %187 : vector<8x32xf32>
    %cst_83 = arith.constant dense<0.000000e+00> : vector<8xf32>
    %189 = vector.multi_reduction <add>, %188, %cst_83 [1] : vector<8x32xf32> to vector<8xf32>
    %190 = vector.shape_cast %189 : vector<8xf32> to vector<8x1xf32>
    %cst_84 = arith.constant 3.200000e+01 : f32
    %191 = vector.broadcast %cst_84 : f32 to vector<8x1xf32>
    %192 = arith.divf %190, %191 : vector<8x1xf32>
    %cst_85 = arith.constant 9.99999996E-13 : f32
    %193 = vector.broadcast %cst_85 : f32 to vector<8x1xf32>
    %194 = arith.addf %192, %193 : vector<8x1xf32>
    %195 = math.rsqrt %194 : vector<8x1xf32>
    %196 = vector.broadcast %195 : vector<8x1xf32> to vector<8x32xf32>
    %197 = arith.mulf %187, %196 : vector<8x32xf32>
    %198 = vector.broadcast %179 : vector<1x32xf32> to vector<8x32xf32>
    %199 = arith.mulf %197, %198 : vector<8x32xf32>
    %200 = vector.broadcast %181 : vector<1x32xf32> to vector<8x32xf32>
    %201 = arith.addf %199, %200 : vector<8x32xf32>
    %c1 = arith.constant 1 : index
    %c0_86 = arith.constant 0 : index
    %c0_87 = arith.constant 0 : index
    %202 = vector.load %arg5[%c1, %c0_86, %c0_87] : memref<2x32x96xbf16, #tpu.memory_space<vmem>>, vector<1x32x96xbf16>
    %203 = vector.shape_cast %202 : vector<1x32x96xbf16> to vector<32x96xbf16>
    %c1_88 = arith.constant 1 : index
    %c0_89 = arith.constant 0 : index
    %c0_90 = arith.constant 0 : index
    %204 = vector.load %arg7[%c1_88, %c0_89, %c0_90] : memref<2x32x32xbf16, #tpu.memory_space<vmem>>, vector<1x32x32xbf16>
    %205 = vector.shape_cast %204 : vector<1x32x32xbf16> to vector<32x32xbf16>
    %c1_91 = arith.constant 1 : index
    %c0_92 = arith.constant 0 : index
    %c0_93 = arith.constant 0 : index
    %206 = vector.load %arg11[%c1_91, %c0_92, %c0_93] : memref<2x32x64xbf16, #tpu.memory_space<vmem>>, vector<1x32x64xbf16>
    %207 = vector.shape_cast %206 : vector<1x32x64xbf16> to vector<32x64xbf16>
    %c1_94 = arith.constant 1 : index
    %c0_95 = arith.constant 0 : index
    %c0_96 = arith.constant 0 : index
    %208 = vector.load %arg13[%c1_94, %c0_95, %c0_96] : memref<2x64x32xbf16, #tpu.memory_space<vmem>>, vector<1x64x32xbf16>
    %209 = vector.shape_cast %208 : vector<1x64x32xbf16> to vector<64x32xbf16>
    %210 = arith.truncf %201 : vector<8x32xf32> to vector<8x32xbf16>
    %cst_97 = arith.constant dense<0.000000e+00> : vector<8x96xf32>
    %211 = tpu.matmul %210, %203, %cst_97 {dimension_numbers = #tpu.dot_dimension_numbers<[1], [0], [0], [1], [0, 0, 1, 1], [], []>} : vector<8x32xbf16>, vector<32x96xbf16>, vector<8x96xf32> -> vector<8x96xf32>
    %c1_98 = arith.constant 1 : index
    %c0_99 = arith.constant 0 : index
    %c0_100 = arith.constant 0 : index
    %212 = vector.load %arg6[%c1_98, %c0_99, %c0_100] : memref<2x1x96xf32, #tpu.memory_space<vmem>>, vector<1x1x96xf32>
    %213 = vector.shape_cast %212 : vector<1x1x96xf32> to vector<1x96xf32>
    %214 = vector.broadcast %213 : vector<1x96xf32> to vector<8x96xf32>
    %215 = arith.addf %211, %214 : vector<8x96xf32>
    %216 = vector.extract_strided_slice %215 {offsets = [0, 0], sizes = [8, 8], strides = [1, 1]} : vector<8x96xf32> to vector<8x8xf32>
    %217 = vector.extract_strided_slice %215 {offsets = [0, 32], sizes = [8, 8], strides = [1, 1]} : vector<8x96xf32> to vector<8x8xf32>
    %218 = vector.extract_strided_slice %215 {offsets = [0, 64], sizes = [8, 8], strides = [1, 1]} : vector<8x96xf32> to vector<8x8xf32>
    %cst_101 = arith.constant dense<0.000000e+00> : vector<8x8xf32>
    %219 = tpu.matmul %216, %217, %cst_101 {dimension_numbers = #tpu.dot_dimension_numbers<[1], [1], [0], [0], [0, 0, 1, 0], [], []>} : vector<8x8xf32>, vector<8x8xf32>, vector<8x8xf32> -> vector<8x8xf32>
    %220 = vector.broadcast %1 : vector<1x8xf32> to vector<8x8xf32>
    %221 = arith.addf %219, %220 : vector<8x8xf32>
    %cst_102 = arith.constant dense<0xFF800000> : vector<8xf32>
    %222 = vector.multi_reduction <maximumf>, %221, %cst_102 [1] : vector<8x8xf32> to vector<8xf32>
    %223 = vector.shape_cast %222 : vector<8xf32> to vector<8x1xf32>
    %224 = vector.broadcast %223 : vector<8x1xf32> to vector<8x8xf32>
    %225 = arith.subf %221, %224 : vector<8x8xf32>
    %226 = math.exp %225 : vector<8x8xf32>
    %cst_103 = arith.constant dense<0.000000e+00> : vector<8xf32>
    %227 = vector.multi_reduction <add>, %226, %cst_103 [1] : vector<8x8xf32> to vector<8xf32>
    %228 = vector.shape_cast %227 : vector<8xf32> to vector<8x1xf32>
    %229 = tpu.reciprocal %228 {approx = true} : vector<8x1xf32> -> vector<8x1xf32>
    %230 = vector.broadcast %229 : vector<8x1xf32> to vector<8x8xf32>
    %231 = arith.mulf %226, %230 : vector<8x8xf32>
    %cst_104 = arith.constant dense<0.000000e+00> : vector<8x8xf32>
    %232 = tpu.matmul %231, %218, %cst_104 {dimension_numbers = #tpu.dot_dimension_numbers<[1], [0], [0], [1], [0, 0, 1, 1], [], []>} : vector<8x8xf32>, vector<8x8xf32>, vector<8x8xf32> -> vector<8x8xf32>
    %233 = arith.truncf %232 : vector<8x8xf32> to vector<8x8xbf16>
    %234 = vector.extract_strided_slice %205 {offsets = [0, 0], sizes = [8, 32], strides = [1, 1]} : vector<32x32xbf16> to vector<8x32xbf16>
    %cst_105 = arith.constant dense<0.000000e+00> : vector<8x32xf32>
    %235 = tpu.matmul %233, %234, %cst_105 {dimension_numbers = #tpu.dot_dimension_numbers<[1], [0], [0], [1], [0, 0, 1, 1], [], []>} : vector<8x8xbf16>, vector<8x32xbf16>, vector<8x32xf32> -> vector<8x32xf32>
    %236 = vector.extract_strided_slice %215 {offsets = [0, 8], sizes = [8, 8], strides = [1, 1]} : vector<8x96xf32> to vector<8x8xf32>
    %237 = vector.extract_strided_slice %215 {offsets = [0, 40], sizes = [8, 8], strides = [1, 1]} : vector<8x96xf32> to vector<8x8xf32>
    %238 = vector.extract_strided_slice %215 {offsets = [0, 72], sizes = [8, 8], strides = [1, 1]} : vector<8x96xf32> to vector<8x8xf32>
    %cst_106 = arith.constant dense<0.000000e+00> : vector<8x8xf32>
    %239 = tpu.matmul %236, %237, %cst_106 {dimension_numbers = #tpu.dot_dimension_numbers<[1], [1], [0], [0], [0, 0, 1, 0], [], []>} : vector<8x8xf32>, vector<8x8xf32>, vector<8x8xf32> -> vector<8x8xf32>
    %240 = vector.broadcast %1 : vector<1x8xf32> to vector<8x8xf32>
    %241 = arith.addf %239, %240 : vector<8x8xf32>
    %cst_107 = arith.constant dense<0xFF800000> : vector<8xf32>
    %242 = vector.multi_reduction <maximumf>, %241, %cst_107 [1] : vector<8x8xf32> to vector<8xf32>
    %243 = vector.shape_cast %242 : vector<8xf32> to vector<8x1xf32>
    %244 = vector.broadcast %243 : vector<8x1xf32> to vector<8x8xf32>
    %245 = arith.subf %241, %244 : vector<8x8xf32>
    %246 = math.exp %245 : vector<8x8xf32>
    %cst_108 = arith.constant dense<0.000000e+00> : vector<8xf32>
    %247 = vector.multi_reduction <add>, %246, %cst_108 [1] : vector<8x8xf32> to vector<8xf32>
    %248 = vector.shape_cast %247 : vector<8xf32> to vector<8x1xf32>
    %249 = tpu.reciprocal %248 {approx = true} : vector<8x1xf32> -> vector<8x1xf32>
    %250 = vector.broadcast %249 : vector<8x1xf32> to vector<8x8xf32>
    %251 = arith.mulf %246, %250 : vector<8x8xf32>
    %cst_109 = arith.constant dense<0.000000e+00> : vector<8x8xf32>
    %252 = tpu.matmul %251, %238, %cst_109 {dimension_numbers = #tpu.dot_dimension_numbers<[1], [0], [0], [1], [0, 0, 1, 1], [], []>} : vector<8x8xf32>, vector<8x8xf32>, vector<8x8xf32> -> vector<8x8xf32>
    %253 = arith.truncf %252 : vector<8x8xf32> to vector<8x8xbf16>
    %254 = vector.extract_strided_slice %205 {offsets = [8, 0], sizes = [8, 32], strides = [1, 1]} : vector<32x32xbf16> to vector<8x32xbf16>
    %cst_110 = arith.constant dense<0.000000e+00> : vector<8x32xf32>
    %255 = tpu.matmul %253, %254, %cst_110 {dimension_numbers = #tpu.dot_dimension_numbers<[1], [0], [0], [1], [0, 0, 1, 1], [], []>} : vector<8x8xbf16>, vector<8x32xbf16>, vector<8x32xf32> -> vector<8x32xf32>
    %256 = arith.addf %235, %255 : vector<8x32xf32>
    %257 = vector.extract_strided_slice %215 {offsets = [0, 16], sizes = [8, 8], strides = [1, 1]} : vector<8x96xf32> to vector<8x8xf32>
    %258 = vector.extract_strided_slice %215 {offsets = [0, 48], sizes = [8, 8], strides = [1, 1]} : vector<8x96xf32> to vector<8x8xf32>
    %259 = vector.extract_strided_slice %215 {offsets = [0, 80], sizes = [8, 8], strides = [1, 1]} : vector<8x96xf32> to vector<8x8xf32>
    %cst_111 = arith.constant dense<0.000000e+00> : vector<8x8xf32>
    %260 = tpu.matmul %257, %258, %cst_111 {dimension_numbers = #tpu.dot_dimension_numbers<[1], [1], [0], [0], [0, 0, 1, 0], [], []>} : vector<8x8xf32>, vector<8x8xf32>, vector<8x8xf32> -> vector<8x8xf32>
    %261 = vector.broadcast %1 : vector<1x8xf32> to vector<8x8xf32>
    %262 = arith.addf %260, %261 : vector<8x8xf32>
    %cst_112 = arith.constant dense<0xFF800000> : vector<8xf32>
    %263 = vector.multi_reduction <maximumf>, %262, %cst_112 [1] : vector<8x8xf32> to vector<8xf32>
    %264 = vector.shape_cast %263 : vector<8xf32> to vector<8x1xf32>
    %265 = vector.broadcast %264 : vector<8x1xf32> to vector<8x8xf32>
    %266 = arith.subf %262, %265 : vector<8x8xf32>
    %267 = math.exp %266 : vector<8x8xf32>
    %cst_113 = arith.constant dense<0.000000e+00> : vector<8xf32>
    %268 = vector.multi_reduction <add>, %267, %cst_113 [1] : vector<8x8xf32> to vector<8xf32>
    %269 = vector.shape_cast %268 : vector<8xf32> to vector<8x1xf32>
    %270 = tpu.reciprocal %269 {approx = true} : vector<8x1xf32> -> vector<8x1xf32>
    %271 = vector.broadcast %270 : vector<8x1xf32> to vector<8x8xf32>
    %272 = arith.mulf %267, %271 : vector<8x8xf32>
    %cst_114 = arith.constant dense<0.000000e+00> : vector<8x8xf32>
    %273 = tpu.matmul %272, %259, %cst_114 {dimension_numbers = #tpu.dot_dimension_numbers<[1], [0], [0], [1], [0, 0, 1, 1], [], []>} : vector<8x8xf32>, vector<8x8xf32>, vector<8x8xf32> -> vector<8x8xf32>
    %274 = arith.truncf %273 : vector<8x8xf32> to vector<8x8xbf16>
    %275 = vector.extract_strided_slice %205 {offsets = [16, 0], sizes = [8, 32], strides = [1, 1]} : vector<32x32xbf16> to vector<8x32xbf16>
    %cst_115 = arith.constant dense<0.000000e+00> : vector<8x32xf32>
    %276 = tpu.matmul %274, %275, %cst_115 {dimension_numbers = #tpu.dot_dimension_numbers<[1], [0], [0], [1], [0, 0, 1, 1], [], []>} : vector<8x8xbf16>, vector<8x32xbf16>, vector<8x32xf32> -> vector<8x32xf32>
    %277 = arith.addf %256, %276 : vector<8x32xf32>
    %278 = vector.extract_strided_slice %215 {offsets = [0, 24], sizes = [8, 8], strides = [1, 1]} : vector<8x96xf32> to vector<8x8xf32>
    %279 = vector.extract_strided_slice %215 {offsets = [0, 56], sizes = [8, 8], strides = [1, 1]} : vector<8x96xf32> to vector<8x8xf32>
    %280 = vector.extract_strided_slice %215 {offsets = [0, 88], sizes = [8, 8], strides = [1, 1]} : vector<8x96xf32> to vector<8x8xf32>
    %cst_116 = arith.constant dense<0.000000e+00> : vector<8x8xf32>
    %281 = tpu.matmul %278, %279, %cst_116 {dimension_numbers = #tpu.dot_dimension_numbers<[1], [1], [0], [0], [0, 0, 1, 0], [], []>} : vector<8x8xf32>, vector<8x8xf32>, vector<8x8xf32> -> vector<8x8xf32>
    %282 = vector.broadcast %1 : vector<1x8xf32> to vector<8x8xf32>
    %283 = arith.addf %281, %282 : vector<8x8xf32>
    %cst_117 = arith.constant dense<0xFF800000> : vector<8xf32>
    %284 = vector.multi_reduction <maximumf>, %283, %cst_117 [1] : vector<8x8xf32> to vector<8xf32>
    %285 = vector.shape_cast %284 : vector<8xf32> to vector<8x1xf32>
    %286 = vector.broadcast %285 : vector<8x1xf32> to vector<8x8xf32>
    %287 = arith.subf %283, %286 : vector<8x8xf32>
    %288 = math.exp %287 : vector<8x8xf32>
    %cst_118 = arith.constant dense<0.000000e+00> : vector<8xf32>
    %289 = vector.multi_reduction <add>, %288, %cst_118 [1] : vector<8x8xf32> to vector<8xf32>
    %290 = vector.shape_cast %289 : vector<8xf32> to vector<8x1xf32>
    %291 = tpu.reciprocal %290 {approx = true} : vector<8x1xf32> -> vector<8x1xf32>
    %292 = vector.broadcast %291 : vector<8x1xf32> to vector<8x8xf32>
    %293 = arith.mulf %288, %292 : vector<8x8xf32>
    %cst_119 = arith.constant dense<0.000000e+00> : vector<8x8xf32>
    %294 = tpu.matmul %293, %280, %cst_119 {dimension_numbers = #tpu.dot_dimension_numbers<[1], [0], [0], [1], [0, 0, 1, 1], [], []>} : vector<8x8xf32>, vector<8x8xf32>, vector<8x8xf32> -> vector<8x8xf32>
    %295 = arith.truncf %294 : vector<8x8xf32> to vector<8x8xbf16>
    %296 = vector.extract_strided_slice %205 {offsets = [24, 0], sizes = [8, 32], strides = [1, 1]} : vector<32x32xbf16> to vector<8x32xbf16>
    %cst_120 = arith.constant dense<0.000000e+00> : vector<8x32xf32>
    %297 = tpu.matmul %295, %296, %cst_120 {dimension_numbers = #tpu.dot_dimension_numbers<[1], [0], [0], [1], [0, 0, 1, 1], [], []>} : vector<8x8xbf16>, vector<8x32xbf16>, vector<8x32xf32> -> vector<8x32xf32>
    %298 = arith.addf %277, %297 : vector<8x32xf32>
    %c1_121 = arith.constant 1 : index
    %c0_122 = arith.constant 0 : index
    %c0_123 = arith.constant 0 : index
    %299 = vector.load %arg8[%c1_121, %c0_122, %c0_123] : memref<2x1x32xf32, #tpu.memory_space<vmem>>, vector<1x1x32xf32>
    %300 = vector.shape_cast %299 : vector<1x1x32xf32> to vector<1x32xf32>
    %301 = vector.broadcast %300 : vector<1x32xf32> to vector<8x32xf32>
    %302 = arith.addf %298, %301 : vector<8x32xf32>
    %303 = arith.addf %302, %201 : vector<8x32xf32>
    %c1_124 = arith.constant 1 : index
    %c0_125 = arith.constant 0 : index
    %c0_126 = arith.constant 0 : index
    %304 = vector.load %arg9[%c1_124, %c0_125, %c0_126] : memref<2x1x32xf32, #tpu.memory_space<vmem>>, vector<1x1x32xf32>
    %305 = vector.shape_cast %304 : vector<1x1x32xf32> to vector<1x32xf32>
    %c1_127 = arith.constant 1 : index
    %c0_128 = arith.constant 0 : index
    %c0_129 = arith.constant 0 : index
    %306 = vector.load %arg10[%c1_127, %c0_128, %c0_129] : memref<2x1x32xf32, #tpu.memory_space<vmem>>, vector<1x1x32xf32>
    %307 = vector.shape_cast %306 : vector<1x1x32xf32> to vector<1x32xf32>
    %cst_130 = arith.constant dense<0.000000e+00> : vector<8xf32>
    %308 = vector.multi_reduction <add>, %303, %cst_130 [1] : vector<8x32xf32> to vector<8xf32>
    %309 = vector.shape_cast %308 : vector<8xf32> to vector<8x1xf32>
    %cst_131 = arith.constant 3.200000e+01 : f32
    %310 = vector.broadcast %cst_131 : f32 to vector<8x1xf32>
    %311 = arith.divf %309, %310 : vector<8x1xf32>
    %312 = vector.broadcast %311 : vector<8x1xf32> to vector<8x32xf32>
    %313 = arith.subf %303, %312 : vector<8x32xf32>
    %314 = arith.mulf %313, %313 : vector<8x32xf32>
    %cst_132 = arith.constant dense<0.000000e+00> : vector<8xf32>
    %315 = vector.multi_reduction <add>, %314, %cst_132 [1] : vector<8x32xf32> to vector<8xf32>
    %316 = vector.shape_cast %315 : vector<8xf32> to vector<8x1xf32>
    %cst_133 = arith.constant 3.200000e+01 : f32
    %317 = vector.broadcast %cst_133 : f32 to vector<8x1xf32>
    %318 = arith.divf %316, %317 : vector<8x1xf32>
    %cst_134 = arith.constant 9.99999996E-13 : f32
    %319 = vector.broadcast %cst_134 : f32 to vector<8x1xf32>
    %320 = arith.addf %318, %319 : vector<8x1xf32>
    %321 = math.rsqrt %320 : vector<8x1xf32>
    %322 = vector.broadcast %321 : vector<8x1xf32> to vector<8x32xf32>
    %323 = arith.mulf %313, %322 : vector<8x32xf32>
    %324 = vector.broadcast %305 : vector<1x32xf32> to vector<8x32xf32>
    %325 = arith.mulf %323, %324 : vector<8x32xf32>
    %326 = vector.broadcast %307 : vector<1x32xf32> to vector<8x32xf32>
    %327 = arith.addf %325, %326 : vector<8x32xf32>
    %328 = arith.truncf %327 : vector<8x32xf32> to vector<8x32xbf16>
    %cst_135 = arith.constant dense<0.000000e+00> : vector<8x64xf32>
    %329 = tpu.matmul %328, %207, %cst_135 {dimension_numbers = #tpu.dot_dimension_numbers<[1], [0], [0], [1], [0, 0, 1, 1], [], []>} : vector<8x32xbf16>, vector<32x64xbf16>, vector<8x64xf32> -> vector<8x64xf32>
    %c1_136 = arith.constant 1 : index
    %c0_137 = arith.constant 0 : index
    %c0_138 = arith.constant 0 : index
    %330 = vector.load %arg12[%c1_136, %c0_137, %c0_138] : memref<2x1x64xf32, #tpu.memory_space<vmem>>, vector<1x1x64xf32>
    %331 = vector.shape_cast %330 : vector<1x1x64xf32> to vector<1x64xf32>
    %332 = vector.broadcast %331 : vector<1x64xf32> to vector<8x64xf32>
    %333 = arith.addf %329, %332 : vector<8x64xf32>
    %cst_139 = arith.constant 5.000000e-01 : f32
    %334 = vector.broadcast %cst_139 : f32 to vector<8x64xf32>
    %335 = arith.mulf %334, %333 : vector<8x64xf32>
    %cst_140 = arith.constant 4.471500e-02 : f32
    %336 = vector.broadcast %cst_140 : f32 to vector<8x64xf32>
    %337 = arith.mulf %336, %333 : vector<8x64xf32>
    %338 = arith.mulf %337, %333 : vector<8x64xf32>
    %339 = arith.mulf %338, %333 : vector<8x64xf32>
    %340 = arith.addf %333, %339 : vector<8x64xf32>
    %cst_141 = arith.constant 0.797884583 : f32
    %341 = vector.broadcast %cst_141 : f32 to vector<8x64xf32>
    %342 = arith.mulf %341, %340 : vector<8x64xf32>
    %343 = math.tanh %342 : vector<8x64xf32>
    %cst_142 = arith.constant 1.000000e+00 : f32
    %344 = vector.broadcast %cst_142 : f32 to vector<8x64xf32>
    %345 = arith.addf %344, %343 : vector<8x64xf32>
    %346 = arith.mulf %335, %345 : vector<8x64xf32>
    %347 = arith.truncf %346 : vector<8x64xf32> to vector<8x64xbf16>
    %cst_143 = arith.constant dense<0.000000e+00> : vector<8x32xf32>
    %348 = tpu.matmul %347, %209, %cst_143 {dimension_numbers = #tpu.dot_dimension_numbers<[1], [0], [0], [1], [0, 0, 1, 1], [], []>} : vector<8x64xbf16>, vector<64x32xbf16>, vector<8x32xf32> -> vector<8x32xf32>
    %c1_144 = arith.constant 1 : index
    %c0_145 = arith.constant 0 : index
    %c0_146 = arith.constant 0 : index
    %349 = vector.load %arg14[%c1_144, %c0_145, %c0_146] : memref<2x1x32xf32, #tpu.memory_space<vmem>>, vector<1x1x32xf32>
    %350 = vector.shape_cast %349 : vector<1x1x32xf32> to vector<1x32xf32>
    %351 = vector.broadcast %350 : vector<1x32xf32> to vector<8x32xf32>
    %352 = arith.addf %348, %351 : vector<8x32xf32>
    %353 = arith.addf %352, %327 : vector<8x32xf32>
    %c1_147 = arith.constant 1 : index
    %c0_148 = arith.constant 0 : index
    %c0_149 = arith.constant 0 : index
    %354 = vector.load %arg15[%c1_147, %c0_148, %c0_149] : memref<2x1x32xf32, #tpu.memory_space<vmem>>, vector<1x1x32xf32>
    %355 = vector.shape_cast %354 : vector<1x1x32xf32> to vector<1x32xf32>
    %c1_150 = arith.constant 1 : index
    %c0_151 = arith.constant 0 : index
    %c0_152 = arith.constant 0 : index
    %356 = vector.load %arg16[%c1_150, %c0_151, %c0_152] : memref<2x1x32xf32, #tpu.memory_space<vmem>>, vector<1x1x32xf32>
    %357 = vector.shape_cast %356 : vector<1x1x32xf32> to vector<1x32xf32>
    %cst_153 = arith.constant dense<0.000000e+00> : vector<8xf32>
    %358 = vector.multi_reduction <add>, %353, %cst_153 [1] : vector<8x32xf32> to vector<8xf32>
    %359 = vector.shape_cast %358 : vector<8xf32> to vector<8x1xf32>
    %cst_154 = arith.constant 3.200000e+01 : f32
    %360 = vector.broadcast %cst_154 : f32 to vector<8x1xf32>
    %361 = arith.divf %359, %360 : vector<8x1xf32>
    %362 = vector.broadcast %361 : vector<8x1xf32> to vector<8x32xf32>
    %363 = arith.subf %353, %362 : vector<8x32xf32>
    %364 = arith.mulf %363, %363 : vector<8x32xf32>
    %cst_155 = arith.constant dense<0.000000e+00> : vector<8xf32>
    %365 = vector.multi_reduction <add>, %364, %cst_155 [1] : vector<8x32xf32> to vector<8xf32>
    %366 = vector.shape_cast %365 : vector<8xf32> to vector<8x1xf32>
    %cst_156 = arith.constant 3.200000e+01 : f32
    %367 = vector.broadcast %cst_156 : f32 to vector<8x1xf32>
    %368 = arith.divf %366, %367 : vector<8x1xf32>
    %cst_157 = arith.constant 9.99999996E-13 : f32
    %369 = vector.broadcast %cst_157 : f32 to vector<8x1xf32>
    %370 = arith.addf %368, %369 : vector<8x1xf32>
    %371 = math.rsqrt %370 : vector<8x1xf32>
    %372 = vector.broadcast %371 : vector<8x1xf32> to vector<8x32xf32>
    %373 = arith.mulf %363, %372 : vector<8x32xf32>
    %374 = vector.broadcast %355 : vector<1x32xf32> to vector<8x32xf32>
    %375 = arith.mulf %373, %374 : vector<8x32xf32>
    %376 = vector.broadcast %357 : vector<1x32xf32> to vector<8x32xf32>
    %377 = arith.addf %375, %376 : vector<8x32xf32>
    %c0_158 = arith.constant 0 : index
    %c0_159 = arith.constant 0 : index
    %c0_160 = arith.constant 0 : index
    %378 = vector.load %arg17[%c0_158, %c0_159, %c0_160] : memref<1x8x32xf32, #tpu.memory_space<vmem>>, vector<1x8x32xf32>
    %379 = vector.shape_cast %378 : vector<1x8x32xf32> to vector<8x32xf32>
    %380 = vector.shape_cast %377 : vector<8x32xf32> to vector<1x8x32xf32>
    tpu.vector_store %arg17[%c0_158, %c0_159, %c0_160], %380 {strides = array<i32>} : memref<1x8x32xf32, #tpu.memory_space<vmem>>, vector<1x8x32xf32>,
    return
  }
  func.func @transform_0(%arg0: i32) -> (i32, i32, i32) {
    %c0_i32 = arith.constant 0 : i32
    %c0_i32_0 = arith.constant 0 : i32
    %c0_i32_1 = arith.constant 0 : i32
    return %arg0, %c0_i32, %c0_i32_0 : i32, i32, i32
  }
  func.func @transform_1(%arg0: i32) -> (i32, i32, i32) {
    %c0_i32 = arith.constant 0 : i32
    %c0_i32_0 = arith.constant 0 : i32
    %c0_i32_1 = arith.constant 0 : i32
    return %arg0, %c0_i32, %c0_i32_0 : i32, i32, i32
  }
  func.func @transform_2(%arg0: i32) -> (i32, i32) {
    %c0_i32 = arith.constant 0 : i32
    %c0_i32_0 = arith.constant 0 : i32
    %c0_i32_1 = arith.constant 0 : i32
    return %c0_i32, %c0_i32_0 : i32, i32
  }
  func.func @transform_3(%arg0: i32) -> (i32, i32) {
    %c0_i32 = arith.constant 0 : i32
    %c0_i32_0 = arith.constant 0 : i32
    %c0_i32_1 = arith.constant 0 : i32
    return %c0_i32, %c0_i32_0 : i32, i32
  }
  func.func @transform_4(%arg0: i32) -> (i32, i32, i32) {
    %c0_i32 = arith.constant 0 : i32
    %c0_i32_0 = arith.constant 0 : i32
    %c0_i32_1 = arith.constant 0 : i32
    %c0_i32_2 = arith.constant 0 : i32
    return %c0_i32, %c0_i32_0, %c0_i32_1 : i32, i32, i32
  }
  func.func @transform_5(%arg0: i32) -> (i32, i32, i32) {
    %c0_i32 = arith.constant 0 : i32
    %c0_i32_0 = arith.constant 0 : i32
    %c0_i32_1 = arith.constant 0 : i32
    %c0_i32_2 = arith.constant 0 : i32
    return %c0_i32, %c0_i32_0, %c0_i32_1 : i32, i32, i32
  }
  func.func @transform_6(%arg0: i32) -> (i32, i32, i32) {
    %c0_i32 = arith.constant 0 : i32
    %c0_i32_0 = arith.constant 0 : i32
    %c0_i32_1 = arith.constant 0 : i32
    %c0_i32_2 = arith.constant 0 : i32
    return %c0_i32, %c0_i32_0, %c0_i32_1 : i32, i32, i32
  }
  func.func @transform_7(%arg0: i32) -> (i32, i32, i32) {
    %c0_i32 = arith.constant 0 : i32
    %c0_i32_0 = arith.constant 0 : i32
    %c0_i32_1 = arith.constant 0 : i32
    %c0_i32_2 = arith.constant 0 : i32
    return %c0_i32, %c0_i32_0, %c0_i32_1 : i32, i32, i32
  }
  func.func @transform_8(%arg0: i32) -> (i32, i32, i32) {
    %c0_i32 = arith.constant 0 : i32
    %c0_i32_0 = arith.constant 0 : i32
    %c0_i32_1 = arith.constant 0 : i32
    %c0_i32_2 = arith.constant 0 : i32
    return %c0_i32, %c0_i32_0, %c0_i32_1 : i32, i32, i32
  }
  func.func @transform_9(%arg0: i32) -> (i32, i32, i32) {
    %c0_i32 = arith.constant 0 : i32
    %c0_i32_0 = arith.constant 0 : i32
    %c0_i32_1 = arith.constant 0 : i32
    %c0_i32_2 = arith.constant 0 : i32
    return %c0_i32, %c0_i32_0, %c0_i32_1 : i32, i32, i32
  }
  func.func @transform_10(%arg0: i32) -> (i32, i32, i32) {
    %c0_i32 = arith.constant 0 : i32
    %c0_i32_0 = arith.constant 0 : i32
    %c0_i32_1 = arith.constant 0 : i32
    %c0_i32_2 = arith.constant 0 : i32
    return %c0_i32, %c0_i32_0, %c0_i32_1 : i32, i32, i32
  }
  func.func @transform_11(%arg0: i32) -> (i32, i32, i32) {
    %c0_i32 = arith.constant 0 : i32
    %c0_i32_0 = arith.constant 0 : i32
    %c0_i32_1 = arith.constant 0 : i32
    %c0_i32_2 = arith.constant 0 : i32
    return %c0_i32, %c0_i32_0, %c0_i32_1 : i32, i32, i32
  }
  func.func @transform_12(%arg0: i32) -> (i32, i32, i32) {
    %c0_i32 = arith.constant 0 : i32
    %c0_i32_0 = arith.constant 0 : i32
    %c0_i32_1 = arith.constant 0 : i32
    %c0_i32_2 = arith.constant 0 : i32
    return %c0_i32, %c0_i32_0, %c0_i32_1 : i32, i32, i32
  }
  func.func @transform_13(%arg0: i32) -> (i32, i32, i32) {
    %c0_i32 = arith.constant 0 : i32
    %c0_i32_0 = arith.constant 0 : i32
    %c0_i32_1 = arith.constant 0 : i32
    %c0_i32_2 = arith.constant 0 : i32
    return %c0_i32, %c0_i32_0, %c0_i32_1 : i32, i32, i32
  }
  func.func @transform_14(%arg0: i32) -> (i32, i32, i32) {
    %c0_i32 = arith.constant 0 : i32
    %c0_i32_0 = arith.constant 0 : i32
    %c0_i32_1 = arith.constant 0 : i32
    %c0_i32_2 = arith.constant 0 : i32
    return %c0_i32, %c0_i32_0, %c0_i32_1 : i32, i32, i32
  }
  func.func @transform_15(%arg0: i32) -> (i32, i32, i32) {
    %c0_i32 = arith.constant 0 : i32
    %c0_i32_0 = arith.constant 0 : i32
    %c0_i32_1 = arith.constant 0 : i32
    %c0_i32_2 = arith.constant 0 : i32
    return %c0_i32, %c0_i32_0, %c0_i32_1 : i32, i32, i32
  }
  func.func @transform_16(%arg0: i32) -> (i32, i32, i32) {
    %c0_i32 = arith.constant 0 : i32
    %c0_i32_0 = arith.constant 0 : i32
    %c0_i32_1 = arith.constant 0 : i32
    return %arg0, %c0_i32, %c0_i32_0 : i32, i32, i32
  }
}

</mosaic_0001>

<bundles_post_ra>
// kernel: bert_forward.1
= control target key start
LH: loop header
LB: loop body
LE: loop exit
PB: predicated region body
PF: predicated region fallthrough
CT: control target
= control target key end

     0   :  { %s3496_s21 = smov 0   ;;  %s3893_s0 = inlined_call_operand.vmem [shape: f32[2,8,32], index: 0, kind: input, shape index: {}]   ;;  %s3894_s1 = inlined_call_operand.vmem [shape: f32[2,1,8], index: 1, kind: input, shape index: {}]   ;;  %s3895_s2 = inlined_call_operand.vmem [shape: f32[1,32], index: 2, kind: input, shape index: {}]   ;;  %s3896_s3 = inlined_call_operand.vmem [shape: f32[1,32], index: 3, kind: input, shape index: {}]   ;;  %s3897_s4 = inlined_call_operand.vmem [shape: bf16[2,32,96], index: 4, kind: input, shape index: {}]   ;;  %s3898_s5 = inlined_call_operand.vmem [shape: f32[2,1,96], index: 5, kind: input, shape index: {}]   ;;  %s3899_s6 = inlined_call_operand.vmem [shape: bf16[2,32,32], index: 6, kind: input, shape index: {}]   ;;  %s3900_s7 = inlined_call_operand.vmem [shape: f32[2,1,32], index: 7, kind: input, shape index: {}]   ;;  %s3901_s8 = inlined_call_operand.vmem [shape: f32[2,1,32], index: 8, kind: input, shape index: {}]   ;;  %s3902_s9 = inlined_call_operand.vmem [shape: f32[2,1,32], index: 9, kind: input, shape index: {}]   ;;  %s3903_s10 = inlined_call_operand.vmem [shape: bf16[2,32,64], index: 10, kind: input, shape index: {}]   ;;  %s3904_s11 = inlined_call_operand.vmem [shape: f32[2,1,64], index: 11, kind: input, shape index: {}]   ;;  %s3905_s12 = inlined_call_operand.vmem [shape: bf16[2,64,32], index: 12, kind: input, shape index: {}]   ;;  %s3906_s13 = inlined_call_operand.vmem [shape: f32[2,1,32], index: 13, kind: input, shape index: {}]   ;;  %s3907_s14 = inlined_call_operand.vmem [shape: f32[2,1,32], index: 14, kind: input, shape index: {}]   ;;  %s3908_s15 = inlined_call_operand.vmem [shape: f32[2,1,32], index: 15, kind: input, shape index: {}]   ;;  %s3909_s16 = inlined_call_operand.vmem [shape: f32[2,8,32], index: 16, kind: output, shape index: {}]  }
   0x1   :  { %3917 = sst [smem:[#allocation2_spill]] %s3893_s0 }
   0x2 LB: > { %s2943_s22 = sadd.s32 4294967295, %s3396_s21   ;;  %p2947_p0 = scmp.ge.s32.totalorder %s3396_s21, 1  ;;  %s3396_s21 = sphi %s3496_s21, %s26_s21  }
   0x3   : > { %p469_p1 = scmp.lt.s32.totalorder %s3396_s21, 3 }
   0x5   : > { %p470_p2 = pnand %p2947_p0, %p469_p1 }
   0x6   : > { %p520_p3 = scmp.lt.s32.totalorder (!%p470_p2), %s2943_s22, 1  ;;  %vm536_vm0 = vcmask (!%p470_p2), 261120   ;;  %s3918_s26 = sld [smem:[#allocation2_spill]] (!%p470_p2)  ;;  %v3328_v7 = vld [vmem:[%s3897_s4] sm:$0xff] (!%p470_p2)   ;;  %v3398_v8 = vmov (!%p470_p2), 0.0   ;;  %v3329_v9 = vld [vmem:[%s3897_s4 + $0x8] sm:$0xff] (!%p470_p2)  }
   0x7   : > { %473 = sbr.rel (%p470_p2) target bundleno = 8190 (0x1ffe), region = 84  ;;  %3123 = vmatprep.subr.bf16.mxu0 (!%p470_p2), %v3398_v8  ;;  %3131 = vmatprep.subr.mxu1 (!%p470_p2), %v3398_v8  ;;  %vm3399_vm1 = vmmov (!%p470_p2), 0   ;;  %v2950_v14 = vld [vmem:[%s3895_s2] ss:$0 sm:$0xff] (!%p470_p2)  ;;  %s3402_s28 = smov (!%p470_p2), 88   ;;  %vm657_vm2 = vcmask (!%p470_p2), 64512  }
   0x8   : > { %3124 = vmatpush3.bf16.msra.mxu0 (!%p470_p2), %v3328_v7  ;;  %3127 = vmatprep.mubr.msk.bf16.mxu0 (!%p470_p2), %vm3399_vm1, %v3398_v8  ;;  %v2951_v16 = vld [vmem:[%s3896_s3] ss:$0 sm:$0xff] (!%p470_p2)  ;;  %s3403_s17 = smov (!%p470_p2), 120   ;;  %s3404_s18 = smov (!%p470_p2), 56   ;;  %vm989_vm3 = vcmask (!%p470_p2), 1043456   ;;  %vm1647_vm4 = vcmask (!%p470_p2), 523264  }
   0x9   : > { %3125 = vmatprep.subr.bf16.mxu0 (!%p470_p2), %v3398_v8  ;;  %3133 = vmatprep.mubr.msk.f32.mxu1 (!%p470_p2), %vm3399_vm1, %v3398_v8  ;;  %v2952_v20 = vld [vmem:[%s3898_s5] ss:$0 sm:$0xff] (!%p470_p2)  ;;  %s3405_s19 = smov (!%p470_p2), 80   ;;  %s3916_s20 = smov (!%p470_p2), 112   ;;  %v570_v55 = vld [vmem:[%s3899_s6 + $0x4] sm:$0xf] (!%p470_p2) }
   0xa   : > { %s3914_s24 = smov (!%p470_p2), 48   ;;  %s3912_s25 = smov (!%p470_p2), 72   ;;  %v991_v56 = vsel (!%p470_p2), %vm989_vm3, %v570_v55, 0  ;;  %v569_v58 = vld [vmem:[%s3899_s6] sm:$0xf] (!%p470_p2) }
   0xb   : > { %v1037_v61 = vsel (!%p470_p2), %vm989_vm3, %v569_v58, 0  ;;  %s3923_s30 = smov (!%p470_p2), 72  }
   0xc   : > { %3126 = vmatpush3.bf16.msra.mxu0 (!%p470_p2), %v3329_v9 }
   0xd   : > { %3146 = vmatprep.subr.mxu0 (!%p470_p2), %v3398_v8 }
   0xe   : > { %s3927_s22 = smov (!%p520_p3, %s2943_s22), 1 }
   0xf   : > { %s3910_s23 = sshll.u32 %s3927_s22, 3  ;;  %s526_s0 = scalar_lea.vmem %s3894_s1, %s3927_s22 }
  0x10   : > { %s523_s27 = scalar_lea.vmem %s3918_s26, %s3910_s23  ;;  %s3915_s26 = smov 64   ;;  %v3563_v28 = vld [vmem:[%s526_s0] ss:$0 sm:$0xff] }
  0x11   : > { %v533_v0 = vld [vmem:[%s523_s27] sm:$0xff]  ;;  %s3401_s27 = smov 96   ;;  %s3913_s23 = smov 104  }
  0x12   : > { %v537_v1 = vsel %vm536_vm0, %v533_v0, 0.0  ;;  %s3911_s0 = smov 40  }
  0x13   : > { %538 = vadd.xlane.f32.xlu0 %v537_v1 }
  0xa0   : > { %v539_v2 = vpop.xlane.xlu0 %538 }
  0xa1   : > { %v541_v3 = vmul.f32 0.03125, %v539_v2 }
  0xa3   : > { %v542_v4 = vsub.f32 %v533_v0, %v541_v3 }
  0xa5   : > { %v543_v5 = vmul.f32 %v542_v4, %v542_v4 }
  0xa7   : > { %v544_v6 = vsel %vm536_vm0, %v543_v5, 0.0 }
  0xa8   : > { %545 = vadd.xlane.f32.xlu0 %v544_v6 }
 0x135   : > { %v546_v10 = vpop.xlane.xlu0 %545 }
 0x136   : > { %v547_v11 = vmul.f32 0.03125, %v546_v10 }
 0x138   : > { %v548_v12 = vadd.f32 1e-12, %v547_v11 }
 0x13a   : > { %3344 = vrsqrt.f32 %v548_v12 }
 0x144   : > { %v3345_v13 = vpop.eup %3344 }
 0x145   : > { %v550_v15 = vmul.f32 %v3345_v13, %v542_v4 }
 0x147   : > { %v557_v17 = vmul.f32 %v2950_v14, %v550_v15 }
 0x149   : > { %v3534_v18 = vadd.f32 %v2951_v16, %v557_v17 }
 0x14b   : > { %v585_v19 = vpack.c.bf16 %v3534_v18, %v3534_v18 }
 0x14d   : > { %3128 = vmatmul.mubr.msk.bf16.vlgmr.msra.gmra.mrb[0].mxu0 %vm536_vm0, %v585_v19 }
 0x14e   : > { %3148 = vmatprep.mubr.msk.f32.mxu0 %vm3399_vm1, %v3398_v8 }
 0x220   : > { %v642_v21 = vpop.f32.mrb[0].mxu0 }
 0x221   : > { %v3544_v22 = vadd.f32 %v2952_v20, %v642_v21  ;;  %v3129_v23 = vpop.f32.mrb[1].mxu0 }
 0x222   : > { %v645_v24 = vpop.f32.mrb[2].mxu0 }
 0x223   : > { %743 = vrot.lane.b32.xlu0 %v3544_v22, %s3915_s26  ;;  %655 = vrot.lane.b32.xlu1 %v3544_v22, %s3401_s27  ;;  %v3130_v25 = vpop.f32.mrb[3].mxu0 }
 0x227   : > { %822 = vrot.lane.b32.xlu0 %v3544_v22, %s3402_s28 }
 0x295   : > { %v656_v26 = vpop.permute.xlu1 %655  ;;  %v744_v27 = vpop.permute.xlu0 %743 }
 0x296   : > { %3132 = vmatpush3.xpose.msk.msra.mxu1 %vm657_vm2, %v656_v26 }
 0x297   : > { %3136 = vmatprep.subr.mxu1 %v3398_v8 }
 0x299   : > { %3134 = vmatmul.mubr.msk.f32.vlgmr.msra.gmra.mrb[0].mxu1 %vm657_vm2, %v3544_v22  ;;  %v823_v38 = vpop.permute.xlu0 %822 }
 0x29a   : > { %3137 = vmatpush3.msra.mxu1 %v744_v27  ;;  %3138 = vmatprep.mubr.msk.f32.mxu1 %vm3399_vm1, %v3398_v8 }
 0x29b   : > { %3141 = vmatprep.subr.mxu1 %v3398_v8 }
 0x36c   : > { %v728_v29 = vpop.f32.mrb[0].mxu1 }
 0x36d   : > { %v729_v30 = vadd.f32 %v3563_v28, %v728_v29  ;;  %v3135_v31 = vpop.f32.mrb[1].mxu1 }
 0x36f   : > { %v732_v32 = vsel %vm657_vm2, %v729_v30, -inf }
 0x370   : > { %733 = vmax.xlane.f32.xlu1 %v732_v32  ;;  %v571_v32 = vld [vmem:[%s3899_s6 + $0x8] sm:$0xf] }
 0x3fd   : > { %v734_v33 = vpop.xlane.xlu1 %733 }
 0x3fe   : > { %v735_v34 = vsub.f32 %v729_v30, %v734_v33  ;;  %v1249_v33 = vsel %vm989_vm3, %v571_v32, 0 }
 0x400   : > { %v736_v35 = vmul.f32 1.442695, %v735_v34 }
 0x402   : > { %3346 = vpow2.f32 %v736_v35 }
 0x40c   : > { %v3347_v36 = vpop.eup %3346 }
 0x40d   : > { %v738_v37 = vsel %vm657_vm2, %v3347_v36, 0.0 }
 0x40e   : > { %739 = vadd.xlane.f32.xlu0 %v738_v37 }
 0x424   : > { %820 = vrot.lane.b32.xlu0 %v3544_v22, %s3403_s17 }
 0x49b   : > { %v740_v39 = vpop.xlane.xlu0 %739 }
 0x49c   : > { %3348 = vrcp.f32 %v740_v39 }
 0x49f   : > { %v821_v42 = vpop.permute.xlu0 %820 }
 0x4a6   : > { %v3349_v40 = vpop.eup %3348 }
 0x4a7   : > { %v742_v41 = vmul.f32 %v3349_v40, %v3347_v36 }
 0x4a9   : > { %3139 = vmatmul.mubr.msk.f32.vlgmr.msra.gmra.mrb[2].mxu1 %vm657_vm2, %v742_v41 }
 0x4aa   : > { %3142 = vmatpush3.xpose.msk.msra.mxu1 %vm657_vm2, %v823_v38  ;;  %3143 = vmatprep.mubr.msk.f32.mxu1 %vm3399_vm1, %v3398_v8 }
 0x4ab   : > { %3151 = vmatprep.subr.bf16.mxu1 %v3398_v8 }
 0x4ad   : > { %3144 = vmatmul.mubr.msk.f32.vlgmr.msra.gmra.mrb[4].mxu1 %vm657_vm2, %v821_v42 }
 0x4ae   : > { %3153 = vmatprep.mubr.msk.bf16.mxu1 %vm3399_vm1, %v3398_v8  ;;  %3152 = vmatpush3.bf16.msra.mxu1 %v991_v56 }
 0x4af   : > { %3163 = vmatprep.subr.mxu1 %v3398_v8 }
 0x57c   : > { %v815_v43 = vpop.f32.mrb[2].mxu1 }
 0x57d   : > { %v3140_v44 = vpop.f32.mrb[3].mxu1  ;;  %v819_v62 = vpack.c.bf16 %v815_v43, %v815_v43 }
 0x580   : > { %v894_v45 = vpop.f32.mrb[4].mxu1 }
 0x581   : > { %v895_v46 = vadd.f32 %v3563_v28, %v894_v45  ;;  %v3145_v47 = vpop.f32.mrb[5].mxu1 }
 0x583   : > { %v898_v48 = vsel %vm657_vm2, %v895_v46, -inf }
 0x584   : > { %899 = vmax.xlane.f32.xlu1 %v898_v48 }
 0x595   : > { %909 = vrot.lane.b32.xlu1 %v3544_v22, %s3404_s18 }
 0x599   : > { %1081 = vrot.lane.b32.xlu1 %v3544_v22, %s3405_s19 }
 0x59d   : > { %1079 = vrot.lane.b32.xlu1 %v3544_v22, %s3916_s20 }
 0x611   : > { %v900_v49 = vpop.xlane.xlu1 %899 }
 0x612   : > { %v901_v50 = vsub.f32 %v895_v46, %v900_v49 }
 0x614   : > { %v902_v51 = vmul.f32 1.442695, %v901_v50 }
 0x615   : > { %v910_v52 = vpop.permute.xlu1 %909 }
 0x616   : > { %3350 = vpow2.f32 %v902_v51  ;;  %3147 = vmatpush3.msra.mxu0 %v910_v52 }
 0x617   : > { %3157 = vmatprep.subr.bf16.mxu0 %v3398_v8 }
 0x619   : > { %v1082_v3 = vpop.permute.xlu1 %1081 }
 0x61d   : > { %v1080_v9 = vpop.permute.xlu1 %1079 }
 0x620   : > { %v3351_v53 = vpop.eup %3350 }
 0x621   : > { %v904_v54 = vsel %vm657_vm2, %v3351_v53, 0.0 }
 0x622   : > { %905 = vadd.xlane.f32.xlu0 %v904_v54  ;;  %v572_v54 = vld [vmem:[%s3899_s6 + $0xc] sm:$0xf] }
 0x623   : > { %v1462_v55 = vsel %vm989_vm3, %v572_v54, 0 }
 0x638   : > { %1168 = vrot.lane.b32.xlu0 %v3544_v22, %s3914_s24  ;;  %s3924_s24 = smov 40  }
 0x63c   : > { %1294 = vrot.lane.b32.xlu0 %v3544_v22, %s3912_s25  ;;  %s3921_s25 = smov 48  }
 0x6af   : > { %v906_v57 = vpop.xlane.xlu0 %905 }
 0x6b0   : > { %3352 = vrcp.f32 %v906_v57 }
 0x6b3   : > { %v1169_v63 = vpop.permute.xlu0 %1168 }
 0x6b7   : > { %v1295_v26 = vpop.permute.xlu0 %1294 }
 0x6ba   : > { %v3353_v59 = vpop.eup %3352 }
 0x6bb   : > { %v908_v60 = vmul.f32 %v3353_v59, %v3351_v53 }
 0x6bd   : > { %3149 = vmatmul.mubr.msk.f32.vlgmr.msra.gmra.mrb[4].mxu0 %vm657_vm2, %v908_v60  ;;  %v2973_v60 = vld [vmem:[%s3900_s7] ss:$0 sm:$0xff] }
 0x6be   : > { %3158 = vmatpush3.bf16.msra.mxu0 %v1037_v61  ;;  %3159 = vmatprep.mubr.msk.bf16.mxu0 %vm3399_vm1, %v3398_v8 }
 0x6bf   : > { %3168 = vmatprep.subr.mxu0 %v3398_v8 }
 0x6c1   : > { %3160 = vmatmul.mubr.msk.bf16.vlgmr.msra.gmra.mrb[8].mxu0 %vm657_vm2, %v819_v62 }
 0x6c2   : > { %3169 = vmatpush3.msra.mxu0 %v1169_v63  ;;  %3170 = vmatprep.mubr.msk.f32.mxu0 %vm3399_vm1, %v3398_v8 }
 0x6c3   : > { %3179 = vmatprep.subr.mxu0 %v3398_v8 }
 0x790   : > { %v981_v0 = vpop.f32.mrb[4].mxu0 }
 0x791   : > { %v985_v1 = vpack.c.bf16 %v981_v0, %v981_v0  ;;  %v3150_v2 = vpop.f32.mrb[5].mxu0 }
 0x793   : > { %3154 = vmatmul.mubr.msk.bf16.vlgmr.msra.gmra.mrb[8].mxu1 %vm657_vm2, %v985_v1 }
 0x794   : > { %3164 = vmatpush3.xpose.msk.msra.mxu1 %vm657_vm2, %v1082_v3  ;;  %v1073_v4 = vpop.f32.mrb[8].mxu0  ;;  %3165 = vmatprep.mubr.msk.f32.mxu1 %vm3399_vm1, %v3398_v8 }
 0x795   : > { %v3161_v5 = vpop.f32.mrb[9].mxu0  ;;  %3173 = vmatprep.subr.bf16.mxu1 %v3398_v8 }
 0x796   : > { %v1076_v6 = vpop.f32.mrb[10].mxu0 }
 0x797   : > { %v3162_v7 = vpop.f32.mrb[11].mxu0 }
 0x79b   : > { %3166 = vmatmul.mubr.msk.f32.vlgmr.msra.gmra.mrb[6].mxu1 %vm657_vm2, %v1080_v9 }
 0x79c   : > { %3175 = vmatprep.mubr.msk.bf16.mxu1 %vm3399_vm1, %v3398_v8  ;;  %3174 = vmatpush3.bf16.msra.mxu1 %v1249_v33 }
 0x79d   : > { %3189 = vmatprep.subr.bf16.mxu1 %v3398_v8 }
 0x866   : > { %v1027_v10 = vpop.f32.mrb[8].mxu1 }
 0x867   : > { %v1074_v11 = vadd.f32 %v1073_v4, %v1027_v10  ;;  %v3155_v12 = vpop.f32.mrb[9].mxu1  ;;  %v3330_v10 = vld [vmem:[%s3903_s10] sm:$0xff]  }
 0x868   : > { %v1030_v13 = vpop.f32.mrb[10].mxu1 }
 0x869   : > { %v3156_v14 = vpop.f32.mrb[11].mxu1 }
 0x86e   : > { %v1153_v15 = vpop.f32.mrb[6].mxu1 }
 0x86f   : > { %v1154_v16 = vadd.f32 %v3563_v28, %v1153_v15  ;;  %v3167_v17 = vpop.f32.mrb[7].mxu1  ;;  %v2974_v15 = vld [vmem:[%s3901_s8] ss:$0 sm:$0xff] }
 0x870   : > { %v2975_v17 = vld [vmem:[%s3902_s9] ss:$0 sm:$0xff] }
 0x871   : > { %v1157_v19 = vsel %vm657_vm2, %v1154_v16, -inf }
 0x872   : > { %1158 = vmax.xlane.f32.xlu1 %v1157_v19 }
 0x8ff   : > { %v1159_v20 = vpop.xlane.xlu1 %1158 }
 0x900   : > { %v1160_v21 = vsub.f32 %v1154_v16, %v1159_v20 }
 0x902   : > { %v1161_v23 = vmul.f32 1.442695, %v1160_v21 }
 0x904   : > { %3354 = vpow2.f32 %v1161_v23  ;;  %v3332_v23 = vld [vmem:[%s3905_s12] sm:$0xff]  }
 0x90e   : > { %v3355_v24 = vpop.eup %3354 }
 0x90f   : > { %v1163_v25 = vsel %vm657_vm2, %v3355_v24, 0.0 }
 0x910   : > { %1164 = vadd.xlane.f32.xlu0 %v1163_v25  ;;  %v3334_v25 = vld [vmem:[%s3905_s12 + $0x10] sm:$0xff]  }
 0x926   : > { %1292 = vrot.lane.b32.xlu0 %v3544_v22, %s3913_s23 }
 0x99d   : > { %v1165_v27 = vpop.xlane.xlu0 %1164 }
 0x99e   : > { %3356 = vrcp.f32 %v1165_v27  ;;  %v2976_v27 = vld [vmem:[%s3904_s11] ss:$0 sm:$0xff] }
 0x9a1   : > { %v1293_v31 = vpop.permute.xlu0 %1292 }
 0x9a8   : > { %v3357_v29 = vpop.eup %3356 }
 0x9a9   : > { %v1167_v30 = vmul.f32 %v3357_v29, %v3355_v24  ;;  %v3333_v24 = vld [vmem:[%s3905_s12 + $0x8] sm:$0xff]  }
 0x9ab   : > { %3171 = vmatmul.mubr.msk.f32.vlgmr.msra.gmra.mrb[6].mxu0 %vm657_vm2, %v1167_v30 }
 0x9ac   : > { %3180 = vmatpush3.xpose.msk.msra.mxu0 %vm657_vm2, %v1295_v26  ;;  %3181 = vmatprep.mubr.msk.f32.mxu0 %vm3399_vm1, %v3398_v8  ;;  %v3335_v26 = vld [vmem:[%s3905_s12 + $0x18] sm:$0xff]  }
 0x9ad   : > { %3184 = vmatprep.subr.mxu0 %v3398_v8 }
 0x9af   : > { %3182 = vmatmul.mubr.msk.f32.vlgmr.msra.gmra.mrb[12].mxu0 %vm657_vm2, %v1293_v31 }
 0x9b0   : > { %3186 = vmatprep.mubr.msk.f32.mxu0 %vm3399_vm1, %v3398_v8 }
 0xa7e   : > { %v1240_v34 = vpop.f32.mrb[6].mxu0 }
 0xa7f   : > { %v1244_v35 = vpack.c.bf16 %v1240_v34, %v1240_v34  ;;  %v3172_v36 = vpop.f32.mrb[7].mxu0 }
 0xa81   : > { %3176 = vmatmul.mubr.msk.bf16.vlgmr.msra.gmra.mrb[12].mxu1 %vm657_vm2, %v1244_v35 }
 0xa82   : > { %v1366_v37 = vpop.f32.mrb[12].mxu0  ;;  %3191 = vmatprep.mubr.msk.bf16.mxu1 %vm3399_vm1, %v3398_v8  ;;  %3190 = vmatpush3.bf16.msra.mxu1 %v1462_v55 }
 0xa83   : > { %v1367_v38 = vadd.f32 %v3563_v28, %v1366_v37  ;;  %v3183_v39 = vpop.f32.mrb[13].mxu0  ;;  %3203 = vmatprep.subr.bf16.mxu1 %v3398_v8 }
 0xa85   : > { %v1370_v40 = vsel %vm657_vm2, %v1367_v38, -inf }
 0xa86   : > { %1371 = vmax.xlane.f32.xlu1 %v1370_v40 }
 0xa97   : > { %1381 = vrot.lane.b32.xlu1 %v3544_v22, %s3911_s0  ;;  %s3922_s0 = smov 104  }
 0xb13   : > { %v1372_v41 = vpop.xlane.xlu1 %1371 }
 0xb14   : > { %v1373_v42 = vsub.f32 %v1367_v38, %v1372_v41 }
 0xb16   : > { %v1374_v43 = vmul.f32 1.442695, %v1373_v42 }
 0xb17   : > { %v1382_v44 = vpop.permute.xlu1 %1381 }
 0xb18   : > { %3358 = vpow2.f32 %v1374_v43  ;;  %3185 = vmatpush3.msra.mxu0 %v1382_v44  ;;  %v2980_v44 = vld [vmem:[%s3906_s13] ss:$0 sm:$0xff] }
 0xb19   : > { %3195 = vmatprep.subr.bf16.mxu0 %v3398_v8 }
 0xb22   : > { %v3359_v45 = vpop.eup %3358 }
 0xb23   : > { %v1376_v46 = vsel %vm657_vm2, %v3359_v45, 0.0 }
 0xb24   : > { %1377 = vadd.xlane.f32.xlu0 %v1376_v46 }
 0xb54   : > { %v1285_v47 = vpop.f32.mrb[12].mxu1 }
 0xb55   : > { %v1291_v48 = vadd.f32 %v1285_v47, %v1074_v11  ;;  %v3177_v49 = vpop.f32.mrb[13].mxu1  ;;  %v3331_v11 = vld [vmem:[%s3903_s10 + $0x8] sm:$0xff]  }
 0xb56   : > { %v1288_v50 = vpop.f32.mrb[14].mxu1 }
 0xb57   : > { %v3178_v51 = vpop.f32.mrb[15].mxu1 }
 0xbb1   : > { %v1378_v52 = vpop.xlane.xlu0 %1377 }
 0xbb2   : > { %3360 = vrcp.f32 %v1378_v52 }
 0xbbc   : > { %v3361_v22 = vpop.eup %3360 }
 0xbbd   : > { %v1380_v53 = vmul.f32 %v3361_v22, %v3359_v45 }
 0xbbf   : > { %3187 = vmatmul.mubr.msk.f32.vlgmr.msra.gmra.mrb[14].mxu0 %vm657_vm2, %v1380_v53 }
 0xbc0   : > { %3199 = vmatprep.mubr.msk.bf16.mxu0 %vm3399_vm1, %v3398_v8  ;;  %3196 = vmatpush3.bf16.msra.mxu0 %v3330_v10 }
 0xbc1   : > { %3197 = vmatprep.subr.bf16.mxu0 %v3398_v8 }
 0xbc4   : > { %3198 = vmatpush3.bf16.msra.mxu0 %v3331_v11 }
 0xbc5   : > { %3215 = vmatprep.subr.bf16.mxu0 %v3398_v8 }
 0xc92   : > { %v1453_v56 = vpop.f32.mrb[14].mxu0 }
 0xc93   : > { %v1457_v57 = vpack.c.bf16 %v1453_v56, %v1453_v56  ;;  %v3188_v58 = vpop.f32.mrb[15].mxu0  ;;  %v3336_v56 = vld [vmem:[%s3897_s4 + $0x10] sm:$0xff]  }
 0xc95   : > { %3192 = vmatmul.mubr.msk.bf16.vlgmr.msra.gmra.mrb[16].mxu1 %vm657_vm2, %v1457_v57  ;;  %v3337_v57 = vld [vmem:[%s3897_s4 + $0x18] sm:$0xff]  }
 0xc96   : > { %3211 = vmatprep.mubr.msk.bf16.mxu1 %vm3399_vm1, %v3398_v8  ;;  %3204 = vmatpush3.bf16.msra.mxu1 %v3332_v23 }
 0xc97   : > { %3205 = vmatprep.subr.bf16.mxu1 %v3398_v8 }
 0xc9a   : > { %3206 = vmatpush3.bf16.msra.mxu1 %v3333_v24 }
 0xc9b   : > { %3207 = vmatprep.subr.bf16.mxu1 %v3398_v8 }
 0xc9e   : > { %3208 = vmatpush3.bf16.msra.mxu1 %v3334_v25 }
 0xc9f   : > { %3209 = vmatprep.subr.bf16.mxu1 %v3398_v8 }
 0xca2   : > { %3210 = vmatpush3.bf16.msra.mxu1 %v3335_v26 }
 0xca3   : > { %3228 = vmatprep.subr.mxu1 %v3398_v8 }
 0xd68   : > { %v1498_v59 = vpop.f32.mrb[16].mxu1 }
 0xd69   : > { %v1504_v61 = vadd.f32 %v1498_v59, %v1291_v48  ;;  %v3193_v62 = vpop.f32.mrb[17].mxu1 }
 0xd6a   : > { %v1501_v63 = vpop.f32.mrb[18].mxu1  ;;  %v2986_v62 = vld [vmem:[%s3907_s14] ss:$0 sm:$0xff] }
 0xd6b   : > { %v1512_v0 = vadd.f32 %v2973_v60, %v1504_v61  ;;  %v3194_v1 = vpop.f32.mrb[19].mxu1 }
 0xd6d   : > { %v1513_v2 = vadd.f32 %v1512_v0, %v3534_v18  ;;  %v2987_v0 = vld [vmem:[%s3908_s15] ss:$0 sm:$0xff] }
 0xd6f   : > { %v1516_v3 = vsel %vm536_vm0, %v1513_v2, 0.0 }
 0xd70   : > { %1517 = vadd.xlane.f32.xlu1 %v1516_v3 }
 0xdfd   : > { %v1518_v4 = vpop.xlane.xlu1 %1517 }
 0xdfe   : > { %v1519_v5 = vmul.f32 0.03125, %v1518_v4  ;;  %v3009_v4 = vld [vmem:[%s3898_s5 + $0x1] ss:$0 sm:$0xff] }
 0xe00   : > { %v1520_v6 = vsub.f32 %v1513_v2, %v1519_v5 }
 0xe02   : > { %v1521_v7 = vmul.f32 %v1520_v6, %v1520_v6 }
 0xe04   : > { %v1522_v9 = vsel %vm536_vm0, %v1521_v7, 0.0 }
 0xe05   : > { %1523 = vadd.xlane.f32.xlu0 %v1522_v9 }
 0xe92   : > { %v1524_v18 = vpop.xlane.xlu0 %1523 }
 0xe93   : > { %v1525_v12 = vmul.f32 0.03125, %v1524_v18 }
 0xe95   : > { %v1526_v13 = vadd.f32 1e-12, %v1525_v12 }
 0xe97   : > { %3362 = vrsqrt.f32 %v1526_v13 }
 0xea1   : > { %v3363_v14 = vpop.eup %3362 }
 0xea2   : > { %v1528_v16 = vmul.f32 %v3363_v14, %v1520_v6 }
 0xea4   : > { %v1535_v19 = vmul.f32 %v2974_v15, %v1528_v16 }
 0xea6   : > { %v1542_v20 = vadd.f32 %v2975_v17, %v1535_v19 }
 0xea8   : > { %v1543_v21 = vpack.c.bf16 %v1542_v20, %v1542_v20 }
 0xeaa   : > { %3200 = vmatmul.mubr.msk.bf16.vlgmr.msra.gmra.mrb[16].mxu0 %vm536_vm0, %v1543_v21 }
 0xeab   : > { %3219 = vmatprep.mubr.msk.bf16.mxu0 %vm3399_vm1, %v3398_v8  ;;  %3216 = vmatpush3.bf16.msra.mxu0 %v3336_v56 }
 0xeac   : > { %3217 = vmatprep.subr.bf16.mxu0 %v3398_v8 }
 0xeaf   : > { %3218 = vmatpush3.bf16.msra.mxu0 %v3337_v57 }
 0xeb0   : > { %3223 = vmatprep.subr.mxu0 %v3398_v8 }
 0xf7d   : > { %v1600_v29 = vpop.f32.mrb[16].mxu0 }
 0xf7e   : > { %v1601_v30 = vadd.f32 %v2976_v27, %v1600_v29  ;;  %v3201_v31 = vpop.f32.mrb[17].mxu0 }
 0xf7f   : > { %v1603_v32 = vpop.f32.mrb[18].mxu0 }
 0xf80   : > { %v1607_v33 = vmul.f32 0.044715, %v1601_v30  ;;  %v3202_v34 = vpop.f32.mrb[19].mxu0  ;;  %v1606_v40 = vmul.f32 0.5, %v1601_v30 }
 0xf81   : > { %v2993_v34 = vld [vmem:[%s3899_s6 + $0x14] sm:$0xf] }
 0xf82   : > { %v1608_v35 = vmul.f32 %v1607_v33, %v1601_v30 }
 0xf84   : > { %v1609_v36 = vmul.f32 %v1608_v35, %v1601_v30  ;;  %v2144_v35 = vsel %vm989_vm3, %v2993_v34, 0 }
 0xf86   : > { %v1610_v37 = vadd.f32 %v1609_v36, %v1601_v30 }
 0xf88   : > { %v1611_v38 = vmul.f32 0.7978846, %v1610_v37 }
 0xf8a   : > { %3364 = vtanh.f32 %v1611_v38 }
 0xf94   : > { %v3365_v39 = vpop.eup %3364 }
 0xf95   : > { %v1613_v41 = vadd.f32 1.0, %v3365_v39 }
 0xf97   : > { %v1614_v42 = vmul.f32 %v1613_v41, %v1606_v40 }
 0xf99   : > { %v1615_v43 = vpack.c.bf16 %v1614_v42, %v1614_v42 }
 0xf9b   : > { %3212 = vmatmul.mubr.msk.bf16.vlgmr.msra.gmra.mrb[20].mxu1 %vm1647_vm4, %v1615_v43 }
 0xf9c   : > { %3230 = vmatprep.mubr.msk.f32.mxu1 %vm3399_vm1, %v3398_v8 }
0x106e   : > { %v1685_v45 = vpop.f32.mrb[20].mxu1 }
0x106f   : > { %v1686_v46 = vadd.f32 %v2980_v44, %v1685_v45  ;;  %v3213_v47 = vpop.f32.mrb[21].mxu1  ;;  %v2992_v44 = vld [vmem:[%s3899_s6 + $0x10] sm:$0xf] }
0x1070   : > { %v1688_v48 = vpop.f32.mrb[22].mxu1  ;;  %v2190_v45 = vsel %vm989_vm3, %v2992_v44, 0 }
0x1071   : > { %v3214_v49 = vpop.f32.mrb[23].mxu1  ;;  %v1691_v50 = vadd.f32 %v1686_v46, %v1542_v20 }
0x1073   : > { %v1694_v51 = vsel %vm536_vm0, %v1691_v50, 0.0 }
0x1074   : > { %1695 = vadd.xlane.f32.xlu0 %v1694_v51 }
0x1101   : > { %v1696_v52 = vpop.xlane.xlu0 %1695 }
0x1102   : > { %v1697_v22 = vmul.f32 0.03125, %v1696_v52 }
0x1104   : > { %v1698_v53 = vsub.f32 %v1691_v50, %v1697_v22 }
0x1106   : > { %v1699_v54 = vmul.f32 %v1698_v53, %v1698_v53 }
0x1108   : > { %v1700_v55 = vsel %vm536_vm0, %v1699_v54, 0.0 }
0x1109   : > { %1701 = vadd.xlane.f32.xlu0 %v1700_v55 }
0x1196   : > { %v1702_v58 = vpop.xlane.xlu0 %1701 }
0x1197   : > { %v1703_v59 = vmul.f32 0.03125, %v1702_v58 }
0x1199   : > { %v1704_v60 = vadd.f32 1e-12, %v1703_v59 }
0x119b   : > { %3366 = vrsqrt.f32 %v1704_v60 }
0x11a5   : > { %v3367_v61 = vpop.eup %3366 }
0x11a6   : > { %v1706_v63 = vmul.f32 %v3367_v61, %v1698_v53 }
0x11a8   : > { %v1713_v1 = vmul.f32 %v2986_v62, %v1706_v63 }
0x11aa   : > { %v3719_v2 = vadd.f32 %v2987_v0, %v1713_v1 }
0x11ac   : > { %v1745_v3 = vpack.c.bf16 %v3719_v2, %v3719_v2 }
0x11ae   : > { %3220 = vmatmul.mubr.msk.bf16.vlgmr.msra.gmra.mrb[20].mxu0 %vm536_vm0, %v1745_v3 }
0x11af   : > { %3225 = vmatprep.mubr.msk.f32.mxu0 %vm3399_vm1, %v3398_v8 }
0x1281   : > { %v1803_v5 = vpop.f32.mrb[20].mxu0 }
0x1282   : > { %v3729_v6 = vadd.f32 %v3009_v4, %v1803_v5  ;;  %v3221_v7 = vpop.f32.mrb[21].mxu0 }
0x1283   : > { %v1806_v9 = vpop.f32.mrb[22].mxu0 }
0x1284   : > { %1976 = vrot.lane.b32.xlu1 %v3729_v6, %s3402_s28  ;;  %1810 = vrot.lane.b32.xlu0 %v3729_v6, %s3401_s27  ;;  %v3222_v10 = vpop.f32.mrb[23].mxu0  ;;  %s3919_s27 = smov 112   ;;  %s3920_s28 = smov 64  }
0x1288   : > { %1974 = vrot.lane.b32.xlu0 %v3729_v6, %s3403_s17 }
0x12f6   : > { %v1811_v11 = vpop.permute.xlu0 %1810  ;;  %v1977_v18 = vpop.permute.xlu1 %1976 }
0x12f7   : > { %3224 = vmatpush3.xpose.msk.msra.mxu0 %vm657_vm2, %v1811_v11 }
0x12f8   : > { %3233 = vmatprep.subr.mxu0 %v3398_v8 }
0x12fa   : > { %3226 = vmatmul.mubr.msk.f32.vlgmr.msra.gmra.mrb[24].mxu0 %vm657_vm2, %v3729_v6  ;;  %v1975_v12 = vpop.permute.xlu0 %1974 }
0x12fb   : > { %3234 = vmatpush3.xpose.msk.msra.mxu0 %vm657_vm2, %v1977_v18  ;;  %3235 = vmatprep.mubr.msk.f32.mxu0 %vm3399_vm1, %v3398_v8 }
0x12fc   : > { %3243 = vmatprep.subr.bf16.mxu0 %v3398_v8 }
0x12fe   : > { %3236 = vmatmul.mubr.msk.f32.vlgmr.msra.gmra.mrb[26].mxu0 %vm657_vm2, %v1975_v12 }
0x12ff   : > { %3245 = vmatprep.mubr.msk.bf16.mxu0 %vm3399_vm1, %v3398_v8  ;;  %3244 = vmatpush3.bf16.msra.mxu0 %v2144_v35 }
0x1300   : > { %3255 = vmatprep.subr.mxu0 %v3398_v8 }
0x13cd   : > { %v1882_v13 = vpop.f32.mrb[24].mxu0 }
0x13ce   : > { %v1883_v14 = vadd.f32 %v3563_v28, %v1882_v13  ;;  %v3227_v15 = vpop.f32.mrb[25].mxu0 }
0x13cf   : > { %v2994_v15 = vld [vmem:[%s3899_s6 + $0x18] sm:$0xf] }
0x13d0   : > { %v1886_v16 = vsel %vm657_vm2, %v1883_v14, -inf }
0x13d1   : > { %1887 = vmax.xlane.f32.xlu0 %v1886_v16  ;;  %v2048_v17 = vpop.f32.mrb[26].mxu0  ;;  %v2402_v16 = vsel %vm989_vm3, %v2994_v15, 0 }
0x13d2   : > { %v2049_v19 = vadd.f32 %v3563_v28, %v2048_v17  ;;  %v3237_v20 = vpop.f32.mrb[27].mxu0 }
0x13d4   : > { %v2052_v21 = vsel %vm657_vm2, %v2049_v19, -inf }
0x13d5   : > { %2053 = vmax.xlane.f32.xlu1 %v2052_v21 }
0x13e6   : > { %2063 = vrot.lane.b32.xlu1 %v3729_v6, %s3404_s18 }
0x13ea   : > { %2234 = vrot.lane.b32.xlu1 %v3729_v6, %s3405_s19 }
0x13ee   : > { %2232 = vrot.lane.b32.xlu1 %v3729_v6, %s3919_s27 }
0x145e   : > { %v1888_v23 = vpop.xlane.xlu0 %1887 }
0x145f   : > { %v1889_v24 = vsub.f32 %v1883_v14, %v1888_v23 }
0x1461   : > { %v1890_v25 = vmul.f32 1.442695, %v1889_v24 }
0x1462   : > { %v2054_v26 = vpop.xlane.xlu1 %2053 }
0x1463   : > { %3368 = vpow2.f32 %v1890_v25  ;;  %v2055_v27 = vsub.f32 %v2049_v19, %v2054_v26 }
0x1465   : > { %v2056_v29 = vmul.f32 1.442695, %v2055_v27 }
0x1466   : > { %v2064_v41 = vpop.permute.xlu1 %2063 }
0x1467   : > { %3370 = vpow2.f32 %v2056_v29 }
0x146a   : > { %v2235_v52 = vpop.permute.xlu1 %2234 }
0x146d   : > { %v3369_v30 = vpop.eup %3368 }
0x146e   : > { %v1892_v31 = vsel %vm657_vm2, %v3369_v30, 0.0  ;;  %v2233_v22 = vpop.permute.xlu1 %2232 }
0x146f   : > { %1893 = vadd.xlane.f32.xlu0 %v1892_v31 }
0x1471   : > { %v3371_v32 = vpop.eup %3370 }
0x1472   : > { %v2058_v33 = vsel %vm657_vm2, %v3371_v32, 0.0 }
0x1473   : > { %2059 = vadd.xlane.f32.xlu0 %v2058_v33 }
0x1489   : > { %1897 = vrot.lane.b32.xlu0 %v3729_v6, %s3920_s28  ;;  %s3925_s28 = sshll.u32 %s3927_s22, 3 }
0x148a   : > { %s530_s19 = scalar_lea.vmem %s3909_s16, %s3925_s28 }
0x14fc   : > { %v1894_v36 = vpop.xlane.xlu0 %1893 }
0x14fd   : > { %3372 = vrcp.f32 %v1894_v36 }
0x1500   : > { %v2060_v37 = vpop.xlane.xlu0 %2059 }
0x1501   : > { %3374 = vrcp.f32 %v2060_v37 }
0x1504   : > { %v1898_v38 = vpop.permute.xlu0 %1897 }
0x1505   : > { %3229 = vmatpush3.msra.mxu1 %v1898_v38 }
0x1506   : > { %3238 = vmatprep.subr.mxu1 %v3398_v8 }
0x1507   : > { %v3373_v39 = vpop.eup %3372 }
0x1508   : > { %v1896_v40 = vmul.f32 %v3373_v39, %v3369_v30 }
0x150a   : > { %3231 = vmatmul.mubr.msk.f32.vlgmr.msra.gmra.mrb[24].mxu1 %vm657_vm2, %v1896_v40 }
0x150b   : > { %v3375_v42 = vpop.eup %3374  ;;  %3239 = vmatpush3.msra.mxu1 %v2064_v41  ;;  %3240 = vmatprep.mubr.msk.f32.mxu1 %vm3399_vm1, %v3398_v8 }
0x150c   : > { %v2062_v43 = vmul.f32 %v3375_v42, %v3371_v32  ;;  %3249 = vmatprep.subr.bf16.mxu1 %v3398_v8 }
0x150e   : > { %3241 = vmatmul.mubr.msk.f32.vlgmr.msra.gmra.mrb[26].mxu1 %vm657_vm2, %v2062_v43 }
0x150f   : > { %3251 = vmatprep.mubr.msk.bf16.mxu1 %vm3399_vm1, %v3398_v8  ;;  %3250 = vmatpush3.bf16.msra.mxu1 %v2190_v45  ;;  %v3030_v45 = vld [vmem:[%s3900_s7 + $0x1] ss:$0 sm:$0xff] }
0x1510   : > { %3260 = vmatprep.subr.mxu1 %v3398_v8 }
0x15dd   : > { %v1969_v46 = vpop.f32.mrb[24].mxu1 }
0x15de   : > { %v1973_v47 = vpack.c.bf16 %v1969_v46, %v1969_v46  ;;  %v3232_v48 = vpop.f32.mrb[25].mxu1 }
0x15e0   : > { %3252 = vmatmul.mubr.msk.bf16.vlgmr.msra.gmra.mrb[28].mxu1 %vm657_vm2, %v1973_v47 }
0x15e1   : > { %v2135_v49 = vpop.f32.mrb[26].mxu1  ;;  %3262 = vmatprep.mubr.msk.f32.mxu1 %vm3399_vm1, %v3398_v8 }
0x15e2   : > { %v2139_v50 = vpack.c.bf16 %v2135_v49, %v2135_v49  ;;  %v3242_v51 = vpop.f32.mrb[27].mxu1 }
0x15e4   : > { %3246 = vmatmul.mubr.msk.bf16.vlgmr.msra.gmra.mrb[28].mxu0 %vm657_vm2, %v2139_v50 }
0x15e5   : > { %3256 = vmatpush3.xpose.msk.msra.mxu0 %vm657_vm2, %v2235_v52  ;;  %3257 = vmatprep.mubr.msk.f32.mxu0 %vm3399_vm1, %v3398_v8 }
0x15e6   : > { %3265 = vmatprep.subr.bf16.mxu0 %v3398_v8 }
0x15ec   : > { %3258 = vmatmul.mubr.msk.f32.vlgmr.msra.gmra.mrb[32].mxu0 %vm657_vm2, %v2233_v22 }
0x15ed   : > { %3267 = vmatprep.mubr.msk.bf16.mxu0 %vm3399_vm1, %v3398_v8  ;;  %3266 = vmatpush3.bf16.msra.mxu0 %v2402_v16 }
0x15ee   : > { %3295 = vmatprep.subr.bf16.mxu0 %v3398_v8 }
0x16b3   : > { %v2226_v53 = vpop.f32.mrb[28].mxu1 }
0x16b4   : > { %v3253_v54 = vpop.f32.mrb[29].mxu1 }
0x16b5   : > { %v2229_v55 = vpop.f32.mrb[30].mxu1 }
0x16b6   : > { %v3254_v56 = vpop.f32.mrb[31].mxu1 }
0x16b7   : > { %v2180_v57 = vpop.f32.mrb[28].mxu0 }
0x16b8   : > { %v2227_v58 = vadd.f32 %v2226_v53, %v2180_v57  ;;  %v3247_v59 = vpop.f32.mrb[29].mxu0  ;;  %v3338_v57 = vld [vmem:[%s3903_s10 + $0x10] sm:$0xff]  }
0x16b9   : > { %v2183_v60 = vpop.f32.mrb[30].mxu0 }
0x16ba   : > { %v3248_v61 = vpop.f32.mrb[31].mxu0 }
0x16bf   : > { %v2306_v62 = vpop.f32.mrb[32].mxu0 }
0x16c0   : > { %v2307_v63 = vadd.f32 %v3563_v28, %v2306_v62  ;;  %v3259_v0 = vpop.f32.mrb[33].mxu0  ;;  %v3033_v62 = vld [vmem:[%s3901_s8 + $0x1] ss:$0 sm:$0xff] }
0x16c1   : > { %v3034_v0 = vld [vmem:[%s3902_s9 + $0x1] ss:$0 sm:$0xff] }
0x16c2   : > { %v2310_v1 = vsel %vm657_vm2, %v2307_v63, -inf }
0x16c3   : > { %2311 = vmax.xlane.f32.xlu0 %v2310_v1 }
0x16d9   : > { %2321 = vrot.lane.b32.xlu0 %v3729_v6, %s3921_s25 }
0x16dd   : > { %2445 = vrot.lane.b32.xlu0 %v3729_v6, %s3922_s0 }
0x1750   : > { %v2312_v3 = vpop.xlane.xlu0 %2311 }
0x1751   : > { %v2313_v4 = vsub.f32 %v2307_v63, %v2312_v3 }
0x1753   : > { %v2314_v5 = vmul.f32 1.442695, %v2313_v4 }
0x1754   : > { %v2322_v7 = vpop.permute.xlu0 %2321 }
0x1755   : > { %3376 = vpow2.f32 %v2314_v5  ;;  %3261 = vmatpush3.msra.mxu1 %v2322_v7  ;;  %v3340_v5 = vld [vmem:[%s3905_s12 + $0x20] sm:$0xff]   ;;  %v3341_v7 = vld [vmem:[%s3905_s12 + $0x28] sm:$0xff]  }
0x1756   : > { %3271 = vmatprep.subr.mxu1 %v3398_v8 }
0x1758   : > { %v2446_v14 = vpop.permute.xlu0 %2445 }
0x175f   : > { %v3377_v9 = vpop.eup %3376 }
0x1760   : > { %v2316_v10 = vsel %vm657_vm2, %v3377_v9, 0.0 }
0x1761   : > { %2317 = vadd.xlane.f32.xlu1 %v2316_v10  ;;  %v3343_v10 = vld [vmem:[%s3905_s12 + $0x38] sm:$0xff]  }
0x1772   : > { %2447 = vrot.lane.b32.xlu1 %v3729_v6, %s3923_s30 }
0x17ee   : > { %v2318_v11 = vpop.xlane.xlu1 %2317 }
0x17ef   : > { %3378 = vrcp.f32 %v2318_v11  ;;  %v3036_v11 = vld [vmem:[%s3904_s11 + $0x1] ss:$0 sm:$0xff] }
0x17f2   : > { %v2448_v13 = vpop.permute.xlu1 %2447 }
0x17f9   : > { %v3379_v18 = vpop.eup %3378 }
0x17fa   : > { %v2320_v12 = vmul.f32 %v3379_v18, %v3377_v9  ;;  %v3342_v9 = vld [vmem:[%s3905_s12 + $0x30] sm:$0xff]  }
0x17fc   : > { %3263 = vmatmul.mubr.msk.f32.vlgmr.msra.gmra.mrb[32].mxu1 %vm657_vm2, %v2320_v12 }
0x17fd   : > { %3272 = vmatpush3.xpose.msk.msra.mxu1 %vm657_vm2, %v2448_v13  ;;  %3273 = vmatprep.mubr.msk.f32.mxu1 %vm3399_vm1, %v3398_v8 }
0x17fe   : > { %3276 = vmatprep.subr.mxu1 %v3398_v8 }
0x1800   : > { %3274 = vmatmul.mubr.msk.f32.vlgmr.msra.gmra.mrb[34].mxu1 %vm657_vm2, %v2446_v14 }
0x1801   : > { %3278 = vmatprep.mubr.msk.f32.mxu1 %vm3399_vm1, %v3398_v8 }
0x18cf   : > { %v2393_v17 = vpop.f32.mrb[32].mxu1 }
0x18d0   : > { %v2397_v19 = vpack.c.bf16 %v2393_v17, %v2393_v17  ;;  %v3264_v20 = vpop.f32.mrb[33].mxu1 }
0x18d2   : > { %3268 = vmatmul.mubr.msk.bf16.vlgmr.msra.gmra.mrb[36].mxu0 %vm657_vm2, %v2397_v19 }
0x18d3   : > { %v2519_v21 = vpop.f32.mrb[34].mxu1  ;;  %3303 = vmatprep.mubr.msk.bf16.mxu0 %vm3399_vm1, %v3398_v8  ;;  %3296 = vmatpush3.bf16.msra.mxu0 %v3340_v5 }
0x18d4   : > { %v2520_v23 = vadd.f32 %v3563_v28, %v2519_v21  ;;  %v3275_v24 = vpop.f32.mrb[35].mxu1  ;;  %3297 = vmatprep.subr.bf16.mxu0 %v3398_v8 }
0x18d6   : > { %v2523_v25 = vsel %vm657_vm2, %v2520_v23, -inf }
0x18d7   : > { %2524 = vmax.xlane.f32.xlu1 %v2523_v25  ;;  %3298 = vmatpush3.bf16.msra.mxu0 %v3341_v7 }
0x18d8   : > { %3299 = vmatprep.subr.bf16.mxu0 %v3398_v8 }
0x18db   : > { %3300 = vmatpush3.bf16.msra.mxu0 %v3342_v9 }
0x18dc   : > { %3301 = vmatprep.subr.bf16.mxu0 %v3398_v8 }
0x18df   : > { %3302 = vmatpush3.bf16.msra.mxu0 %v3343_v10 }
0x1964   : > { %v2525_v26 = vpop.xlane.xlu1 %2524 }
0x1965   : > { %v2526_v27 = vsub.f32 %v2520_v23, %v2525_v26 }
0x1967   : > { %v2527_v29 = vmul.f32 1.442695, %v2526_v27  ;;  %v3041_v27 = vld [vmem:[%s3906_s13 + $0x1] ss:$0 sm:$0xff] }
0x1969   : > { %3380 = vpow2.f32 %v2527_v29 }
0x1973   : > { %v3381_v30 = vpop.eup %3380 }
0x1974   : > { %v2529_v31 = vsel %vm657_vm2, %v3381_v30, 0.0 }
0x1975   : > { %2530 = vadd.xlane.f32.xlu0 %v2529_v31 }
0x198b   : > { %2534 = vrot.lane.b32.xlu0 %v3729_v6, %s3924_s24  ;;  %v2995_v6 = vld [vmem:[%s3899_s6 + $0x1c] sm:$0xf] }
0x198c   : > { %v2615_v40 = vsel %vm989_vm3, %v2995_v6, 0 }
0x19a5   : > { %v2438_v32 = vpop.f32.mrb[36].mxu0 }
0x19a6   : > { %v2444_v33 = vadd.f32 %v2438_v32, %v2227_v58  ;;  %v3269_v34 = vpop.f32.mrb[37].mxu0  ;;  %v3339_v58 = vld [vmem:[%s3903_s10 + $0x18] sm:$0xff]  }
0x19a7   : > { %v2441_v35 = vpop.f32.mrb[38].mxu0 }
0x19a8   : > { %v3270_v28 = vpop.f32.mrb[39].mxu0 }
0x1a02   : > { %v2531_v36 = vpop.xlane.xlu0 %2530 }
0x1a03   : > { %3382 = vrcp.f32 %v2531_v36 }
0x1a06   : > { %v2535_v37 = vpop.permute.xlu0 %2534 }
0x1a07   : > { %3277 = vmatpush3.msra.mxu1 %v2535_v37 }
0x1a08   : > { %3281 = vmatprep.subr.bf16.mxu1 %v3398_v8 }
0x1a0d   : > { %v3383_v38 = vpop.eup %3382 }
0x1a0e   : > { %v2533_v39 = vmul.f32 %v3383_v38, %v3381_v30 }
0x1a10   : > { %3279 = vmatmul.mubr.msk.f32.vlgmr.msra.gmra.mrb[36].mxu1 %vm657_vm2, %v2533_v39 }
0x1a11   : > { %3283 = vmatprep.mubr.msk.bf16.mxu1 %vm3399_vm1, %v3398_v8  ;;  %3282 = vmatpush3.bf16.msra.mxu1 %v2615_v40 }
0x1a12   : > { %3287 = vmatprep.subr.bf16.mxu1 %v3398_v8 }
0x1ae3   : > { %v2606_v41 = vpop.f32.mrb[36].mxu1 }
0x1ae4   : > { %v2610_v42 = vpack.c.bf16 %v2606_v41, %v2606_v41  ;;  %v3280_v43 = vpop.f32.mrb[37].mxu1 }
0x1ae5   : > { %v3049_v43 = vld [vmem:[%s3907_s14 + $0x1] ss:$0 sm:$0xff] }
0x1ae6   : > { %3284 = vmatmul.mubr.msk.bf16.vlgmr.msra.gmra.mrb[40].mxu1 %vm657_vm2, %v2610_v42 }
0x1ae7   : > { %3291 = vmatprep.mubr.msk.bf16.mxu1 %vm3399_vm1, %v3398_v8  ;;  %3288 = vmatpush3.bf16.msra.mxu1 %v3338_v57 }
0x1ae8   : > { %3289 = vmatprep.subr.bf16.mxu1 %v3398_v8 }
0x1aeb   : > { %3290 = vmatpush3.bf16.msra.mxu1 %v3339_v58 }
0x1bb9   : > { %v2651_v44 = vpop.f32.mrb[40].mxu1 }
0x1bba   : > { %v2657_v46 = vadd.f32 %v2651_v44, %v2444_v33  ;;  %v3285_v47 = vpop.f32.mrb[41].mxu1 }
0x1bbb   : > { %v2654_v48 = vpop.f32.mrb[42].mxu1 }
0x1bbc   : > { %v2666_v49 = vadd.f32 %v3030_v45, %v2657_v46  ;;  %v3286_v50 = vpop.f32.mrb[43].mxu1  ;;  %v3050_v45 = vld [vmem:[%s3908_s15 + $0x1] ss:$0 sm:$0xff] }
0x1bbe   : > { %v2667_v51 = vadd.f32 %v2666_v49, %v3719_v2 }
0x1bc0   : > { %v2672_v52 = vsel %vm536_vm0, %v2667_v51, 0.0 }
0x1bc1   : > { %2673 = vadd.xlane.f32.xlu1 %v2672_v52 }
0x1c4e   : > { %v2674_v22 = vpop.xlane.xlu1 %2673 }
0x1c4f   : > { %v2675_v53 = vmul.f32 0.03125, %v2674_v22 }
0x1c51   : > { %v2676_v54 = vsub.f32 %v2667_v51, %v2675_v53 }
0x1c53   : > { %v2677_v55 = vmul.f32 %v2676_v54, %v2676_v54 }
0x1c55   : > { %v2678_v56 = vsel %vm536_vm0, %v2677_v55, 0.0 }
0x1c56   : > { %2679 = vadd.xlane.f32.xlu1 %v2678_v56 }
0x1ce3   : > { %v2680_v2 = vpop.xlane.xlu1 %2679 }
0x1ce4   : > { %v2681_v59 = vmul.f32 0.03125, %v2680_v2 }
0x1ce6   : > { %v2682_v60 = vadd.f32 1e-12, %v2681_v59 }
0x1ce8   : > { %3384 = vrsqrt.f32 %v2682_v60 }
0x1cf2   : > { %v3385_v61 = vpop.eup %3384 }
0x1cf3   : > { %v2684_v63 = vmul.f32 %v3385_v61, %v2676_v54 }
0x1cf5   : > { %v2691_v1 = vmul.f32 %v3033_v62, %v2684_v63 }
0x1cf7   : > { %v2698_v3 = vadd.f32 %v3034_v0, %v2691_v1 }
0x1cf9   : > { %v2699_v4 = vpack.c.bf16 %v2698_v3, %v2698_v3 }
0x1cfb   : > { %3292 = vmatmul.mubr.msk.bf16.vlgmr.msra.gmra.mrb[44].mxu1 %vm536_vm0, %v2699_v4 }
0x1dce   : > { %v2757_v18 = vpop.f32.mrb[44].mxu1 }
0x1dcf   : > { %v2758_v12 = vadd.f32 %v3036_v11, %v2757_v18  ;;  %v3293_v13 = vpop.f32.mrb[45].mxu1 }
0x1dd0   : > { %v2760_v14 = vpop.f32.mrb[46].mxu1 }
0x1dd1   : > { %v2764_v15 = vmul.f32 0.044715, %v2758_v12  ;;  %v3294_v16 = vpop.f32.mrb[47].mxu1  ;;  %v2763_v24 = vmul.f32 0.5, %v2758_v12 }
0x1dd3   : > { %v2765_v17 = vmul.f32 %v2764_v15, %v2758_v12 }
0x1dd5   : > { %v2766_v19 = vmul.f32 %v2765_v17, %v2758_v12 }
0x1dd7   : > { %v2767_v20 = vadd.f32 %v2766_v19, %v2758_v12 }
0x1dd9   : > { %v2768_v21 = vmul.f32 0.7978846, %v2767_v20 }
0x1ddb   : > { %3386 = vtanh.f32 %v2768_v21 }
0x1de5   : > { %v3387_v23 = vpop.eup %3386 }
0x1de6   : > { %v2770_v25 = vadd.f32 1.0, %v3387_v23 }
0x1de8   : > { %v2771_v8 = vmul.f32 %v2770_v25, %v2763_v24 }
0x1dea   : > { %v2772_v26 = vpack.c.bf16 %v2771_v8, %v2771_v8 }
0x1dec   : > { %3304 = vmatmul.mubr.msk.bf16.vlgmr.msra.gmra.mrb[40].mxu0 %vm1647_vm4, %v2772_v26 }
0x1ebf   : > { %v2842_v29 = vpop.f32.mrb[40].mxu0 }
0x1ec0   : > { %v2843_v30 = vadd.f32 %v3041_v27, %v2842_v29  ;;  %v3305_v31 = vpop.f32.mrb[41].mxu0 }
0x1ec1   : > { %v2845_v32 = vpop.f32.mrb[42].mxu0 }
0x1ec2   : > { %v3306_v33 = vpop.f32.mrb[43].mxu0  ;;  %v2848_v34 = vadd.f32 %v2843_v30, %v2698_v3 }
0x1ec4   : > { %v2853_v35 = vsel %vm536_vm0, %v2848_v34, 0.0 }
0x1ec5   : > { %2854 = vadd.xlane.f32.xlu1 %v2853_v35 }
0x1f52   : > { %v2855_v28 = vpop.xlane.xlu1 %2854 }
0x1f53   : > { %v2856_v36 = vmul.f32 0.03125, %v2855_v28 }
0x1f55   : > { %v2857_v37 = vsub.f32 %v2848_v34, %v2856_v36 }
0x1f57   : > { %v2858_v38 = vmul.f32 %v2857_v37, %v2857_v37 }
0x1f59   : > { %v2859_v39 = vsel %vm536_vm0, %v2858_v38, 0.0 }
0x1f5a   : > { %2860 = vadd.xlane.f32.xlu1 %v2859_v39 }
0x1fe7   : > { %v2861_v6 = vpop.xlane.xlu1 %2860 }
0x1fe8   : > { %v2862_v40 = vmul.f32 0.03125, %v2861_v6 }
0x1fea   : > { %v2863_v41 = vadd.f32 1e-12, %v2862_v40 }
0x1fec   : > { %3388 = vrsqrt.f32 %v2863_v41 }
0x1ff6   : > { %v3389_v42 = vpop.eup %3388 }
0x1ff7   : > { %v2865_v44 = vmul.f32 %v3389_v42, %v2857_v37 }
0x1ff9   : > { %v2872_v46 = vmul.f32 %v3049_v43, %v2865_v44 }
0x1ffb   : > { %v2879_v47 = vadd.f32 %v3050_v45, %v2872_v46 }
0x1ffd   : > { %2880 = vst.msk [vmem:[%s530_s19] sm:$0xff] %vm536_vm0, %v2879_v47 }
0x1ffe PF: > { %s26_s21 = sadd.s32 1, %s3396_s21  }
0x1fff   : > { %p23_p4 = scmp.ge.s32.totalorder %s26_s21, 4  }
0x2001   :  { %25 = sbr.rel (!%p23_p4) target bundleno = 2 (0x2), region = 129 }

</bundles_post_ra>
